<compile_context>
chip_gen: v5e
topology: v5e:2x2
jax: 0.10.0
libtpu: 0.0.40
codegen_flags: <defaults>
</compile_context>

<pallas_src>
import jax
import jax.numpy as jnp
from jax.experimental import pallas as pl
from jax.experimental.pallas import tpu as pltpu

BN_EPS = 1e-5


def _up_conv_phase_kernel(xm_ref, xb0_ref, xb1_ref, w_ref, y_ref, s_ref):
    # xm_ref : (1, RB, W+2, Cin)   padded rows [rb*RB, rb*RB+RB)   == orig rows r0-1 .. r0+RB-2
    # xb0_ref: (1, 1,  W+2, Cin)   padded row   rb*RB+RB           == orig row  r0+RB-1
    # xb1_ref: (1, 1,  W+2, Cin)   padded row   rb*RB+RB+1         == orig row  r0+RB
    # w_ref  : (9, Cin, 4*Cout)    phase-folded 3x3-neighbourhood taps, t = 3*a + b
    # y_ref  : (1, 1, RB*W, 4*Cout) pre-BN conv output (quad-major rows, phase*channel lanes)
    # s_ref  : (1, 1, 2, 4*Cout)   per-tile partial [sum, sum-of-squares]
    _, RB, Wp, Cin = xm_ref.shape
    W = Wp - 2

    # Original-resolution tile incl. 1-pixel halo: (RB+2, W+2, Cin).
    xt = jnp.concatenate([xm_ref[0], xb0_ref[0], xb1_ref[0]], axis=0)

    # 9 neighbourhood taps -> one (RB*W, 4*Cout) f32 accumulator (half the MXU work of
    # convolving the upsampled image).
    # TODO(synk): for large Cin, build a single K=9*Cin im2col slab (one MXU push) instead of
    # 9 accumulating K=Cin dots; kept as separate dots here to avoid a lane-axis concatenate,
    # since with Cin=4 the kernel is DMA/overhead bound regardless.
    acc = None
    for a in range(3):
        for b in range(3):
            t = 3 * a + b
            win = xt[a:a + RB, b:b + W, :].reshape(RB * W, Cin)
            part = jnp.dot(win, w_ref[t], preferred_element_type=jnp.float32)
            acc = part if acc is None else acc + part

    # Per-tile BN partial statistics (per phase*channel lane; phases/tiles folded on the host).
    s_ref[0, 0, 0:1, :] = jnp.sum(acc, axis=0, keepdims=True)
    s_ref[0, 0, 1:2, :] = jnp.sum(acc * acc, axis=0, keepdims=True)

    y_ref[0, 0] = acc


def _bn_relu_kernel(y_ref, a_ref, b_ref, o_ref):
    # Fused BN(train-mode)+affine+ReLU epilogue: y = relu(conv * scale + shift).
    y = y_ref[0, 0]                          # (RB*W, 4*Cout)
    o_ref[0, 0] = jnp.maximum(y * a_ref[...] + b_ref[...], 0.0)


def up_conv_forward(x_nchw, w_oihw, bias, gamma, beta):
    """Pallas forward. x_nchw: (N, Cin, H, W); w_oihw: (Cout, Cin, 3, 3)."""
    N, Cin, H, W = x_nchw.shape
    Cout = w_oihw.shape[0]
    Hu, Wu = 2 * H, 2 * W
    PC = 4 * Cout                                             # phase*channel lane width

    RB = next(r for r in (8, 4, 2, 1) if H % r == 0)          # original rows per tile (16 out rows)
    nrb = H // RB
    Wp = W + 2

    # ---- glue (layout only): NCHW->NHWC + 1px zero halo.  No upsample in HBM. ----
    # NOTE: cast to bf16 here for v6e/v7x MXU peak; kept f32 so the 1e-4 check vs f32 ref holds.
    x_nhwc = jnp.transpose(x_nchw, (0, 2, 3, 1)).astype(jnp.float32)
    x_pad = jnp.pad(x_nhwc, ((0, 0), (1, 1), (1, 1), (0, 0)))

    # ---- fold Upsample(2x nearest) into per-phase weights over the 3x3 original neighbourhood:
    # out[2i+py, 2j+px] = sum_{a,b} W[py,px,a,b] . x[i-1+a, j-1+b]
    w_k = jnp.transpose(w_oihw, (2, 3, 1, 0)).astype(jnp.float32)   # (3,3,Cin,Cout)
    AMAP = ((0, 1, 1), (1, 1, 2))                                   # tap offset per (phase, k-index)
    w_big = jnp.zeros((9, Cin, 4, Cout), jnp.float32)
    for py in range(2):
        for px in range(2):
            p = 2 * py + px
            for kh in range(3):
                for kw in range(3):
                    t = 3 * AMAP[py][kh] + AMAP[px][kw]
                    w_big = w_big.at[t, :, p, :].add(w_k[kh, kw])
    w_big = w_big.reshape(9, Cin, PC)
    # Conv bias is cancelled exactly by train-mode BN mean subtraction -> not added in-kernel.
    del bias

    cparams = pltpu.CompilerParams(
        dimension_semantics=("parallel", "parallel"),   # batch & row-block tiles are independent
        vmem_limit_bytes=32 * 1024 * 1024)

    # ---- pass 1: fused upsample+conv per (batch, row-block) tile + BN partial stats ----
    y_conv, part = pl.pallas_call(
        _up_conv_phase_kernel,
        out_shape=(jax.ShapeDtypeStruct((N, nrb, RB * W, PC), jnp.float32),
                   jax.ShapeDtypeStruct((N, nrb, 2, PC), jnp.float32)),
        grid=(N, nrb),
        in_specs=[
            pl.BlockSpec((1, RB, Wp, Cin), lambda n, r: (n, r, 0, 0)),
            pl.BlockSpec((1, 1, Wp, Cin), lambda n, r: (n, r * RB + RB, 0, 0)),
            pl.BlockSpec((1, 1, Wp, Cin), lambda n, r: (n, r * RB + RB + 1, 0, 0)),
            pl.BlockSpec((9, Cin, PC), lambda n, r: (0, 0, 0)),
        ],
        out_specs=(
            pl.BlockSpec((1, 1, RB * W, PC), lambda n, r: (n, r, 0, 0)),
            pl.BlockSpec((1, 1, 2, PC), lambda n, r: (n, r, 0, 0)),
        ),
        compiler_params=cparams,
    )(x_pad, x_pad, x_pad, w_big)

    # ---- tiny stats combine (per-channel, over all tiles & phases) -> fused scale/shift ----
    ps = part.reshape(N, nrb, 2, 4, Cout).sum(axis=(0, 1, 3))        # (2, Cout)
    cnt = jnp.float32(N * Hu * Wu)
    mean = ps[0] / cnt
    var = ps[1] / cnt - mean * mean                                  # biased var (train mode)
    scale = gamma.astype(jnp.float32) * jax.lax.rsqrt(var + BN_EPS)
    shift = beta.astype(jnp.float32) - mean * scale
    scale4 = jnp.tile(scale, 4).reshape(1, PC)
    shift4 = jnp.tile(shift, 4).reshape(1, PC)

    # ---- pass 2: normalize + affine + ReLU, same tiling / lane layout ----
    y_act = pl.pallas_call(
        _bn_relu_kernel,
        out_shape=jax.ShapeDtypeStruct((N, nrb, RB * W, PC), jnp.float32),
        grid=(N, nrb),
        in_specs=[
            pl.BlockSpec((1, 1, RB * W, PC), lambda n, r: (n, r, 0, 0)),
            pl.BlockSpec((1, PC), lambda n, r: (0, 0)),
            pl.BlockSpec((1, PC), lambda n, r: (0, 0)),
        ],
        out_specs=pl.BlockSpec((1, 1, RB * W, PC), lambda n, r: (n, r, 0, 0)),
        compiler_params=cparams,
    )(y_conv, scale4, shift4)

    # ---- glue (layout only): interleave phases back to NCHW ----
    y = y_act.reshape(N, nrb, RB, W, 2, 2, Cout)          # n, rb, i, j, py, px, o
    y = jnp.transpose(y, (0, 6, 1, 2, 4, 3, 5))           # n, o, rb, i, py, j, px
    return y.reshape(N, Cout, Hu, Wu)


def up_conv_reference(x_nchw, w_oihw, bias, gamma, beta):
    """Pure-JAX reference matching PyTorch semantics (train-mode BN)."""
    x = jnp.repeat(jnp.repeat(x_nchw, 2, axis=2), 2, axis=3)
    y = jax.lax.conv_general_dilated(
        x, w_oihw, window_strides=(1, 1), padding=((1, 1), (1, 1)),
        dimension_numbers=("NCHW", "OIHW", "NCHW"))
    y = y + bias[None, :, None, None]
    mean = y.mean(axis=(0, 2, 3), keepdims=True)
    var = ((y - mean) ** 2).mean(axis=(0, 2, 3), keepdims=True)
    y = (y - mean) * jax.lax.rsqrt(var + BN_EPS)
    y = y * gamma[None, :, None, None] + beta[None, :, None, None]
    return jnp.maximum(y, 0.0)


if __name__ == "__main__":
    # Small deterministic setup: in_ch=4, out_ch=8, x: (2, 4, 16, 16)
    key = jax.random.PRNGKey(0)
    k_x, k_w, k_b, k_g, k_be = jax.random.split(key, 5)

    N, Cin, H, W = 2, 4, 16, 16
    Cout = 8

    x = jax.random.normal(k_x, (N, Cin, H, W), dtype=jnp.float32)
    w = 0.1 * jax.random.normal(k_w, (Cout, Cin, 3, 3), dtype=jnp.float32)
    b = 0.1 * jax.random.normal(k_b, (Cout,), dtype=jnp.float32)
    gamma = 1.0 + 0.1 * jax.random.normal(k_g, (Cout,), dtype=jnp.float32)
    beta = 0.1 * jax.random.normal(k_be, (Cout,), dtype=jnp.float32)

    fwd = jax.jit(up_conv_forward)
    out = jax.block_until_ready(fwd(x, w, b, gamma, beta))

    ref = jax.block_until_ready(up_conv_reference(x, w, b, gamma, beta))
    assert out.shape == (N, Cout, 2 * H, 2 * W), out.shape
    assert jnp.allclose(out, ref, atol=1e-4, rtol=1e-4), float(jnp.max(jnp.abs(out - ref)))

    print("KERNEL_OK")
</pallas_src>

<mosaic_0001>
module attributes {stable_mosaic.version = 11 : i64} {
  func.func @_up_conv_phase_kernel(%arg0: i32, %arg1: i32, %arg2: memref<1x8x18x4xf32, #tpu.memory_space<vmem>>, %arg3: memref<1x1x18x4xf32, #tpu.memory_space<vmem>>, %arg4: memref<1x1x18x4xf32, #tpu.memory_space<vmem>>, %arg5: memref<9x4x32xf32, #tpu.memory_space<vmem>>, %arg6: memref<1x1x128x32xf32, #tpu.memory_space<vmem>>, %arg7: memref<1x1x2x32xf32, #tpu.memory_space<vmem>>) attributes {dimension_semantics = [#tpu.dimension_semantics<parallel>, #tpu.dimension_semantics<parallel>], iteration_bounds = array<i64: 2, 2>, scalar_prefetch = 0 : i64, scratch_operands = 0 : i64, tpu.core_type = #tpu.core_type<tc>, window_params = [{transform_indices = @transform_0, window_bounds = array<i64: 1, 8, 18, 4>}, {transform_indices = @transform_1, window_bounds = array<i64: 1, 1, 18, 4>}, {transform_indices = @transform_2, window_bounds = array<i64: 1, 1, 18, 4>}, {pipeline_mode = #tpu.pipeline_mode<synchronous>, transform_indices = @transform_3, window_bounds = array<i64: 9, 4, 32>}, {transform_indices = @transform_4, window_bounds = array<i64: 1, 1, 128, 32>}, {transform_indices = @transform_5, window_bounds = array<i64: 1, 1, 2, 32>}]} {
    %c0 = arith.constant 0 : index
    %c0_0 = arith.constant 0 : index
    %c0_1 = arith.constant 0 : index
    %c0_2 = arith.constant 0 : index
    %0 = vector.load %arg2[%c0, %c0_0, %c0_1, %c0_2] : memref<1x8x18x4xf32, #tpu.memory_space<vmem>>, vector<1x8x18x4xf32>
    %1 = vector.shape_cast %0 : vector<1x8x18x4xf32> to vector<8x18x4xf32>
    %c0_3 = arith.constant 0 : index
    %c0_4 = arith.constant 0 : index
    %c0_5 = arith.constant 0 : index
    %c0_6 = arith.constant 0 : index
    %2 = vector.load %arg3[%c0_3, %c0_4, %c0_5, %c0_6] : memref<1x1x18x4xf32, #tpu.memory_space<vmem>>, vector<1x1x18x4xf32>
    %3 = vector.shape_cast %2 : vector<1x1x18x4xf32> to vector<1x18x4xf32>
    %c0_7 = arith.constant 0 : index
    %c0_8 = arith.constant 0 : index
    %c0_9 = arith.constant 0 : index
    %c0_10 = arith.constant 0 : index
    %4 = vector.load %arg4[%c0_7, %c0_8, %c0_9, %c0_10] : memref<1x1x18x4xf32, #tpu.memory_space<vmem>>, vector<1x1x18x4xf32>
    %5 = vector.shape_cast %4 : vector<1x1x18x4xf32> to vector<1x18x4xf32>
    %6 = tpu.concatenate %1, %3, %5 in 0 : vector<8x18x4xf32>, vector<1x18x4xf32>, vector<1x18x4xf32> -> vector<10x18x4xf32>
    %7 = vector.extract_strided_slice %6 {offsets = [0, 0, 0], sizes = [8, 16, 4], strides = [1, 1, 1]} : vector<10x18x4xf32> to vector<8x16x4xf32>
    %8 = vector.shape_cast %7 : vector<8x16x4xf32> to vector<128x4xf32>
    %c0_11 = arith.constant 0 : index
    %c0_12 = arith.constant 0 : index
    %c0_13 = arith.constant 0 : index
    %9 = vector.load %arg5[%c0_11, %c0_12, %c0_13] : memref<9x4x32xf32, #tpu.memory_space<vmem>>, vector<1x4x32xf32>
    %10 = vector.shape_cast %9 : vector<1x4x32xf32> to vector<4x32xf32>
    %cst = arith.constant dense<0.000000e+00> : vector<128x32xf32>
    %11 = tpu.matmul %8, %10, %cst {dimension_numbers = #tpu.dot_dimension_numbers<[1], [0], [0], [1], [0, 0, 1, 1], [], []>} : vector<128x4xf32>, vector<4x32xf32>, vector<128x32xf32> -> vector<128x32xf32>
    %12 = vector.extract_strided_slice %6 {offsets = [0, 1, 0], sizes = [8, 16, 4], strides = [1, 1, 1]} : vector<10x18x4xf32> to vector<8x16x4xf32>
    %13 = vector.shape_cast %12 : vector<8x16x4xf32> to vector<128x4xf32>
    %c1 = arith.constant 1 : index
    %c0_14 = arith.constant 0 : index
    %c0_15 = arith.constant 0 : index
    %14 = vector.load %arg5[%c1, %c0_14, %c0_15] : memref<9x4x32xf32, #tpu.memory_space<vmem>>, vector<1x4x32xf32>
    %15 = vector.shape_cast %14 : vector<1x4x32xf32> to vector<4x32xf32>
    %cst_16 = arith.constant dense<0.000000e+00> : vector<128x32xf32>
    %16 = tpu.matmul %13, %15, %cst_16 {dimension_numbers = #tpu.dot_dimension_numbers<[1], [0], [0], [1], [0, 0, 1, 1], [], []>} : vector<128x4xf32>, vector<4x32xf32>, vector<128x32xf32> -> vector<128x32xf32>
    %17 = arith.addf %11, %16 : vector<128x32xf32>
    %18 = vector.extract_strided_slice %6 {offsets = [0, 2, 0], sizes = [8, 16, 4], strides = [1, 1, 1]} : vector<10x18x4xf32> to vector<8x16x4xf32>
    %19 = vector.shape_cast %18 : vector<8x16x4xf32> to vector<128x4xf32>
    %c2 = arith.constant 2 : index
    %c0_17 = arith.constant 0 : index
    %c0_18 = arith.constant 0 : index
    %20 = vector.load %arg5[%c2, %c0_17, %c0_18] : memref<9x4x32xf32, #tpu.memory_space<vmem>>, vector<1x4x32xf32>
    %21 = vector.shape_cast %20 : vector<1x4x32xf32> to vector<4x32xf32>
    %cst_19 = arith.constant dense<0.000000e+00> : vector<128x32xf32>
    %22 = tpu.matmul %19, %21, %cst_19 {dimension_numbers = #tpu.dot_dimension_numbers<[1], [0], [0], [1], [0, 0, 1, 1], [], []>} : vector<128x4xf32>, vector<4x32xf32>, vector<128x32xf32> -> vector<128x32xf32>
    %23 = arith.addf %17, %22 : vector<128x32xf32>
    %24 = vector.extract_strided_slice %6 {offsets = [1, 0, 0], sizes = [8, 16, 4], strides = [1, 1, 1]} : vector<10x18x4xf32> to vector<8x16x4xf32>
    %25 = vector.shape_cast %24 : vector<8x16x4xf32> to vector<128x4xf32>
    %c3 = arith.constant 3 : index
    %c0_20 = arith.constant 0 : index
    %c0_21 = arith.constant 0 : index
    %26 = vector.load %arg5[%c3, %c0_20, %c0_21] : memref<9x4x32xf32, #tpu.memory_space<vmem>>, vector<1x4x32xf32>
    %27 = vector.shape_cast %26 : vector<1x4x32xf32> to vector<4x32xf32>
    %cst_22 = arith.constant dense<0.000000e+00> : vector<128x32xf32>
    %28 = tpu.matmul %25, %27, %cst_22 {dimension_numbers = #tpu.dot_dimension_numbers<[1], [0], [0], [1], [0, 0, 1, 1], [], []>} : vector<128x4xf32>, vector<4x32xf32>, vector<128x32xf32> -> vector<128x32xf32>
    %29 = arith.addf %23, %28 : vector<128x32xf32>
    %30 = vector.extract_strided_slice %6 {offsets = [1, 1, 0], sizes = [8, 16, 4], strides = [1, 1, 1]} : vector<10x18x4xf32> to vector<8x16x4xf32>
    %31 = vector.shape_cast %30 : vector<8x16x4xf32> to vector<128x4xf32>
    %c4 = arith.constant 4 : index
    %c0_23 = arith.constant 0 : index
    %c0_24 = arith.constant 0 : index
    %32 = vector.load %arg5[%c4, %c0_23, %c0_24] : memref<9x4x32xf32, #tpu.memory_space<vmem>>, vector<1x4x32xf32>
    %33 = vector.shape_cast %32 : vector<1x4x32xf32> to vector<4x32xf32>
    %cst_25 = arith.constant dense<0.000000e+00> : vector<128x32xf32>
    %34 = tpu.matmul %31, %33, %cst_25 {dimension_numbers = #tpu.dot_dimension_numbers<[1], [0], [0], [1], [0, 0, 1, 1], [], []>} : vector<128x4xf32>, vector<4x32xf32>, vector<128x32xf32> -> vector<128x32xf32>
    %35 = arith.addf %29, %34 : vector<128x32xf32>
    %36 = vector.extract_strided_slice %6 {offsets = [1, 2, 0], sizes = [8, 16, 4], strides = [1, 1, 1]} : vector<10x18x4xf32> to vector<8x16x4xf32>
    %37 = vector.shape_cast %36 : vector<8x16x4xf32> to vector<128x4xf32>
    %c5 = arith.constant 5 : index
    %c0_26 = arith.constant 0 : index
    %c0_27 = arith.constant 0 : index
    %38 = vector.load %arg5[%c5, %c0_26, %c0_27] : memref<9x4x32xf32, #tpu.memory_space<vmem>>, vector<1x4x32xf32>
    %39 = vector.shape_cast %38 : vector<1x4x32xf32> to vector<4x32xf32>
    %cst_28 = arith.constant dense<0.000000e+00> : vector<128x32xf32>
    %40 = tpu.matmul %37, %39, %cst_28 {dimension_numbers = #tpu.dot_dimension_numbers<[1], [0], [0], [1], [0, 0, 1, 1], [], []>} : vector<128x4xf32>, vector<4x32xf32>, vector<128x32xf32> -> vector<128x32xf32>
    %41 = arith.addf %35, %40 : vector<128x32xf32>
    %42 = vector.extract_strided_slice %6 {offsets = [2, 0, 0], sizes = [8, 16, 4], strides = [1, 1, 1]} : vector<10x18x4xf32> to vector<8x16x4xf32>
    %43 = vector.shape_cast %42 : vector<8x16x4xf32> to vector<128x4xf32>
    %c6 = arith.constant 6 : index
    %c0_29 = arith.constant 0 : index
    %c0_30 = arith.constant 0 : index
    %44 = vector.load %arg5[%c6, %c0_29, %c0_30] : memref<9x4x32xf32, #tpu.memory_space<vmem>>, vector<1x4x32xf32>
    %45 = vector.shape_cast %44 : vector<1x4x32xf32> to vector<4x32xf32>
    %cst_31 = arith.constant dense<0.000000e+00> : vector<128x32xf32>
    %46 = tpu.matmul %43, %45, %cst_31 {dimension_numbers = #tpu.dot_dimension_numbers<[1], [0], [0], [1], [0, 0, 1, 1], [], []>} : vector<128x4xf32>, vector<4x32xf32>, vector<128x32xf32> -> vector<128x32xf32>
    %47 = arith.addf %41, %46 : vector<128x32xf32>
    %48 = vector.extract_strided_slice %6 {offsets = [2, 1, 0], sizes = [8, 16, 4], strides = [1, 1, 1]} : vector<10x18x4xf32> to vector<8x16x4xf32>
    %49 = vector.shape_cast %48 : vector<8x16x4xf32> to vector<128x4xf32>
    %c7 = arith.constant 7 : index
    %c0_32 = arith.constant 0 : index
    %c0_33 = arith.constant 0 : index
    %50 = vector.load %arg5[%c7, %c0_32, %c0_33] : memref<9x4x32xf32, #tpu.memory_space<vmem>>, vector<1x4x32xf32>
    %51 = vector.shape_cast %50 : vector<1x4x32xf32> to vector<4x32xf32>
    %cst_34 = arith.constant dense<0.000000e+00> : vector<128x32xf32>
    %52 = tpu.matmul %49, %51, %cst_34 {dimension_numbers = #tpu.dot_dimension_numbers<[1], [0], [0], [1], [0, 0, 1, 1], [], []>} : vector<128x4xf32>, vector<4x32xf32>, vector<128x32xf32> -> vector<128x32xf32>
    %53 = arith.addf %47, %52 : vector<128x32xf32>
    %54 = vector.extract_strided_slice %6 {offsets = [2, 2, 0], sizes = [8, 16, 4], strides = [1, 1, 1]} : vector<10x18x4xf32> to vector<8x16x4xf32>
    %55 = vector.shape_cast %54 : vector<8x16x4xf32> to vector<128x4xf32>
    %c8 = arith.constant 8 : index
    %c0_35 = arith.constant 0 : index
    %c0_36 = arith.constant 0 : index
    %56 = vector.load %arg5[%c8, %c0_35, %c0_36] : memref<9x4x32xf32, #tpu.memory_space<vmem>>, vector<1x4x32xf32>
    %57 = vector.shape_cast %56 : vector<1x4x32xf32> to vector<4x32xf32>
    %cst_37 = arith.constant dense<0.000000e+00> : vector<128x32xf32>
    %58 = tpu.matmul %55, %57, %cst_37 {dimension_numbers = #tpu.dot_dimension_numbers<[1], [0], [0], [1], [0, 0, 1, 1], [], []>} : vector<128x4xf32>, vector<4x32xf32>, vector<128x32xf32> -> vector<128x32xf32>
    %59 = arith.addf %53, %58 : vector<128x32xf32>
    %cst_38 = arith.constant dense<0.000000e+00> : vector<32xf32>
    %60 = vector.multi_reduction <add>, %59, %cst_38 [0] : vector<128x32xf32> to vector<32xf32>
    %61 = vector.shape_cast %60 : vector<32xf32> to vector<1x32xf32>
    %c0_39 = arith.constant 0 : index
    %c0_40 = arith.constant 0 : index
    %c0_41 = arith.constant 0 : index
    %c0_42 = arith.constant 0 : index
    %62 = vector.load %arg7[%c0_39, %c0_40, %c0_41, %c0_42] : memref<1x1x2x32xf32, #tpu.memory_space<vmem>>, vector<1x1x1x32xf32>
    %63 = vector.shape_cast %62 : vector<1x1x1x32xf32> to vector<1x32xf32>
    %64 = vector.shape_cast %61 : vector<1x32xf32> to vector<1x1x1x32xf32>
    tpu.vector_store %arg7[%c0_39, %c0_40, %c0_41, %c0_42], %64 {strides = array<i32>} : memref<1x1x2x32xf32, #tpu.memory_space<vmem>>, vector<1x1x1x32xf32>,
    %65 = arith.mulf %59, %59 : vector<128x32xf32>
    %cst_43 = arith.constant dense<0.000000e+00> : vector<32xf32>
    %66 = vector.multi_reduction <add>, %65, %cst_43 [0] : vector<128x32xf32> to vector<32xf32>
    %67 = vector.shape_cast %66 : vector<32xf32> to vector<1x32xf32>
    %c0_44 = arith.constant 0 : index
    %c0_45 = arith.constant 0 : index
    %c1_46 = arith.constant 1 : index
    %c0_47 = arith.constant 0 : index
    %68 = vector.load %arg7[%c0_44, %c0_45, %c1_46, %c0_47] : memref<1x1x2x32xf32, #tpu.memory_space<vmem>>, vector<1x1x1x32xf32>
    %69 = vector.shape_cast %68 : vector<1x1x1x32xf32> to vector<1x32xf32>
    %70 = vector.shape_cast %67 : vector<1x32xf32> to vector<1x1x1x32xf32>
    tpu.vector_store %arg7[%c0_44, %c0_45, %c1_46, %c0_47], %70 {strides = array<i32>} : memref<1x1x2x32xf32, #tpu.memory_space<vmem>>, vector<1x1x1x32xf32>,
    %c0_48 = arith.constant 0 : index
    %c0_49 = arith.constant 0 : index
    %c0_50 = arith.constant 0 : index
    %c0_51 = arith.constant 0 : index
    %71 = vector.load %arg6[%c0_48, %c0_49, %c0_50, %c0_51] : memref<1x1x128x32xf32, #tpu.memory_space<vmem>>, vector<1x1x128x32xf32>
    %72 = vector.shape_cast %71 : vector<1x1x128x32xf32> to vector<128x32xf32>
    %73 = vector.shape_cast %59 : vector<128x32xf32> to vector<1x1x128x32xf32>
    tpu.vector_store %arg6[%c0_48, %c0_49, %c0_50, %c0_51], %73 {strides = array<i32>} : memref<1x1x128x32xf32, #tpu.memory_space<vmem>>, vector<1x1x128x32xf32>,
    return
  }
  func.func @transform_0(%arg0: i32, %arg1: i32) -> (i32, i32, i32, i32) {
    %c0_i32 = arith.constant 0 : i32
    %c0_i32_0 = arith.constant 0 : i32
    %c0_i32_1 = arith.constant 0 : i32
    return %arg0, %arg1, %c0_i32, %c0_i32_0 : i32, i32, i32, i32
  }
  func.func @transform_1(%arg0: i32, %arg1: i32) -> (i32, i32, i32, i32) {
    %c8_i32 = arith.constant 8 : i32
    %0 = arith.muli %arg1, %c8_i32 : i32
    %c8_i32_0 = arith.constant 8 : i32
    %1 = arith.addi %0, %c8_i32_0 : i32
    %c0_i32 = arith.constant 0 : i32
    %c0_i32_1 = arith.constant 0 : i32
    %c0_i32_2 = arith.constant 0 : i32
    return %arg0, %1, %c0_i32, %c0_i32_1 : i32, i32, i32, i32
  }
  func.func @transform_2(%arg0: i32, %arg1: i32) -> (i32, i32, i32, i32) {
    %c8_i32 = arith.constant 8 : i32
    %0 = arith.muli %arg1, %c8_i32 : i32
    %c8_i32_0 = arith.constant 8 : i32
    %1 = arith.addi %0, %c8_i32_0 : i32
    %c1_i32 = arith.constant 1 : i32
    %2 = arith.addi %1, %c1_i32 : i32
    %c0_i32 = arith.constant 0 : i32
    %c0_i32_1 = arith.constant 0 : i32
    %c0_i32_2 = arith.constant 0 : i32
    return %arg0, %2, %c0_i32, %c0_i32_1 : i32, i32, i32, i32
  }
  func.func @transform_3(%arg0: i32, %arg1: i32) -> (i32, i32, i32) {
    %c0_i32 = arith.constant 0 : i32
    %c0_i32_0 = arith.constant 0 : i32
    %c0_i32_1 = arith.constant 0 : i32
    %c0_i32_2 = arith.constant 0 : i32
    return %c0_i32, %c0_i32_0, %c0_i32_1 : i32, i32, i32
  }
  func.func @transform_4(%arg0: i32, %arg1: i32) -> (i32, i32, i32, i32) {
    %c0_i32 = arith.constant 0 : i32
    %c0_i32_0 = arith.constant 0 : i32
    %c0_i32_1 = arith.constant 0 : i32
    return %arg0, %arg1, %c0_i32, %c0_i32_0 : i32, i32, i32, i32
  }
  func.func @transform_5(%arg0: i32, %arg1: i32) -> (i32, i32, i32, i32) {
    %c0_i32 = arith.constant 0 : i32
    %c0_i32_0 = arith.constant 0 : i32
    %c0_i32_1 = arith.constant 0 : i32
    return %arg0, %arg1, %c0_i32, %c0_i32_0 : i32, i32, i32, i32
  }
}

module attributes {stable_mosaic.version = 11 : i64} {
  func.func @_bn_relu_kernel(%arg0: i32, %arg1: i32, %arg2: memref<1x1x128x32xf32, #tpu.memory_space<vmem>>, %arg3: memref<1x32xf32, #tpu.memory_space<vmem>>, %arg4: memref<1x32xf32, #tpu.memory_space<vmem>>, %arg5: memref<1x1x128x32xf32, #tpu.memory_space<vmem>>) attributes {dimension_semantics = [#tpu.dimension_semantics<parallel>, #tpu.dimension_semantics<parallel>], iteration_bounds = array<i64: 2, 2>, scalar_prefetch = 0 : i64, scratch_operands = 0 : i64, tpu.core_type = #tpu.core_type<tc>, window_params = [{transform_indices = @transform_0, window_bounds = array<i64: 1, 1, 128, 32>}, {pipeline_mode = #tpu.pipeline_mode<synchronous>, transform_indices = @transform_1, window_bounds = array<i64: 1, 32>}, {pipeline_mode = #tpu.pipeline_mode<synchronous>, transform_indices = @transform_2, window_bounds = array<i64: 1, 32>}, {transform_indices = @transform_3, window_bounds = array<i64: 1, 1, 128, 32>}]} {
    %c0 = arith.constant 0 : index
    %c0_0 = arith.constant 0 : index
    %c0_1 = arith.constant 0 : index
    %c0_2 = arith.constant 0 : index
    %0 = vector.load %arg2[%c0, %c0_0, %c0_1, %c0_2] : memref<1x1x128x32xf32, #tpu.memory_space<vmem>>, vector<1x1x128x32xf32>
    %1 = vector.shape_cast %0 : vector<1x1x128x32xf32> to vector<128x32xf32>
    %c0_3 = arith.constant 0 : index
    %c0_4 = arith.constant 0 : index
    %2 = vector.load %arg3[%c0_3, %c0_4] : memref<1x32xf32, #tpu.memory_space<vmem>>, vector<1x32xf32>
    %3 = vector.broadcast %2 : vector<1x32xf32> to vector<128x32xf32>
    %4 = arith.mulf %1, %3 : vector<128x32xf32>
    %c0_5 = arith.constant 0 : index
    %c0_6 = arith.constant 0 : index
    %5 = vector.load %arg4[%c0_5, %c0_6] : memref<1x32xf32, #tpu.memory_space<vmem>>, vector<1x32xf32>
    %6 = vector.broadcast %5 : vector<1x32xf32> to vector<128x32xf32>
    %7 = arith.addf %4, %6 : vector<128x32xf32>
    %cst = arith.constant 0.000000e+00 : f32
    %8 = vector.broadcast %cst : f32 to vector<128x32xf32>
    %9 = arith.maximumf %7, %8 : vector<128x32xf32>
    %c0_7 = arith.constant 0 : index
    %c0_8 = arith.constant 0 : index
    %c0_9 = arith.constant 0 : index
    %c0_10 = arith.constant 0 : index
    %10 = vector.load %arg5[%c0_7, %c0_8, %c0_9, %c0_10] : memref<1x1x128x32xf32, #tpu.memory_space<vmem>>, vector<1x1x128x32xf32>
    %11 = vector.shape_cast %10 : vector<1x1x128x32xf32> to vector<128x32xf32>
    %12 = vector.shape_cast %9 : vector<128x32xf32> to vector<1x1x128x32xf32>
    tpu.vector_store %arg5[%c0_7, %c0_8, %c0_9, %c0_10], %12 {strides = array<i32>} : memref<1x1x128x32xf32, #tpu.memory_space<vmem>>, vector<1x1x128x32xf32>,
    return
  }
  func.func @transform_0(%arg0: i32, %arg1: i32) -> (i32, i32, i32, i32) {
    %c0_i32 = arith.constant 0 : i32
    %c0_i32_0 = arith.constant 0 : i32
    %c0_i32_1 = arith.constant 0 : i32
    return %arg0, %arg1, %c0_i32, %c0_i32_0 : i32, i32, i32, i32
  }
  func.func @transform_1(%arg0: i32, %arg1: i32) -> (i32, i32) {
    %c0_i32 = arith.constant 0 : i32
    %c0_i32_0 = arith.constant 0 : i32
    %c0_i32_1 = arith.constant 0 : i32
    return %c0_i32, %c0_i32_0 : i32, i32
  }
  func.func @transform_2(%arg0: i32, %arg1: i32) -> (i32, i32) {
    %c0_i32 = arith.constant 0 : i32
    %c0_i32_0 = arith.constant 0 : i32
    %c0_i32_1 = arith.constant 0 : i32
    return %c0_i32, %c0_i32_0 : i32, i32
  }
  func.func @transform_3(%arg0: i32, %arg1: i32) -> (i32, i32, i32, i32) {
    %c0_i32 = arith.constant 0 : i32
    %c0_i32_0 = arith.constant 0 : i32
    %c0_i32_1 = arith.constant 0 : i32
    return %arg0, %arg1, %c0_i32, %c0_i32_0 : i32, i32, i32, i32
  }
}

</mosaic_0001>

<bundles_post_ra>
// kernel: tile.18
= control target key start
LH: loop header
LB: loop body
LE: loop exit
PB: predicated region body
PF: predicated region fallthrough
CT: control target
= control target key end

     0   :  { %s22_s0 = inlined_call_operand.vmem [shape: f32[8], index: 0, kind: input, shape index: {}]   ;;  %s23_s1 = inlined_call_operand.vmem [shape: f32[4,8], index: 1, kind: output, shape index: {}]  }
   0x1   :  { %v4_v0 = vld [vmem:[%s22_s0] ss:$0 sm:$0xff] }
   0x2   :  { %5 = vst [vmem:[%s23_s1] sm:$0xf] %v4_v0 }

// kernel: tile.19
= control target key start
LH: loop header
LB: loop body
LE: loop exit
PB: predicated region body
PF: predicated region fallthrough
CT: control target
= control target key end

     0   :  { %s37_s8 = smov 8   ;;  %s38_s9 = smov 16   ;;  %vm7_vm0 = vcmask 64512   ;;  %vm13_vm1 = vcmask 261312   ;;  %vm19_vm2 = vcmask 195712   ;;  %vm25_vm3 = vcmask 130112   ;;  %s55_s0 = inlined_call_operand.vmem [shape: f32[4,8], index: 0, kind: input, shape index: {}]   ;;  %s56_s1 = inlined_call_operand.vmem [shape: f32[1,32], index: 1, kind: output, shape index: {}]  }
   0x1   :  { %v4_v0 = vld [vmem:[%s55_s0] sm:$0xf]  ;;  %s36_s0 = smov 24  }
   0x2   :  { %5 = vst [vmem:[#allocation1] sm:$0xf] %v4_v0 }
   0x9   :  { %v10_v1 = vld [vmem:[#allocation1 + $0x3] sm:$0x1]   ;;  %v22_v2 = vld [vmem:[#allocation1 + $0x1] sm:$0x1]   ;;  %v16_v3 = vld [vmem:[#allocation1 + $0x2] sm:$0x1]  }
   0xa   :  { %11 = vrot.lane.b32.xlu0 %v10_v1, %s36_s0  ;;  %23 = vrot.lane.b32.xlu1 %v22_v2, %s37_s8  ;;  %v6_v4 = vld [vmem:[#allocation1] sm:$0x1]  }
   0xb   :  { %8 = vst.msk [vmem:[#allocation0] sm:$0x1] %vm7_vm0, %v6_v4  }
  0x12   :  { %17 = vrot.lane.b32.xlu0 %v16_v3, %s38_s9 }
  0x7c   :  { %v12_v5 = vpop.permute.xlu0 %11   ;;  %v24_v6 = vpop.permute.xlu1 %23  }
  0x7d   :  { %14 = vst.msk [vmem:[#allocation0] sm:$0x1] %vm13_vm1, %v12_v5  }
  0x84   :  { %v18_v7 = vpop.permute.xlu0 %17  }
  0x85   :  { %20 = vst.msk [vmem:[#allocation0] sm:$0x1] %vm19_vm2, %v18_v7  }
  0x86   :  { %26 = vst.msk [vmem:[#allocation0] sm:$0x1] %vm25_vm3, %v24_v6  }
  0x8d   :  { %v29_v8 = vld [vmem:[#allocation0] sm:$0x1] }
  0x8e   :  { %32 = vst [vmem:[%s56_s1] sm:$0x1] %v29_v8 }

// kernel: up_conv_forward.3
= control target key start
LH: loop header
LB: loop body
LE: loop exit
PB: predicated region body
PF: predicated region fallthrough
CT: control target
= control target key end

     0   :  { %s506_s12 = smov 0   ;;  %s508_s13 = smov 0   ;;  %s633_s0 = inlined_call_operand.vmem [shape: f32[2,2,128,32], index: 0, kind: input, shape index: {}]   ;;  %s634_s1 = inlined_call_operand.vmem [shape: f32[1,32], index: 1, kind: input, shape index: {}]   ;;  %s635_s2 = inlined_call_operand.vmem [shape: f32[1,32], index: 2, kind: input, shape index: {}]   ;;  %s636_s3 = inlined_call_operand.vmem [shape: f32[2,2,128,32], index: 3, kind: output, shape index: {}]  }
   0x1   :  { %s510_s14 = smov 0   ;;  %s512_s15 = smov 0  }
   0x2   :  { %s514_s16 = smov 0  }
   0x3 LB: > { %s22_s17 = sadd.s32 1, %s476_s14  ;;  %s25_s18 = sadd.s32 1, %s480_s15  ;;  %s484_s16 = sphi %s514_s16, %s13_s16   ;;  %s480_s15 = sphi %s512_s15, %s640_s15   ;;  %s476_s14 = sphi %s510_s14, %s639_s14   ;;  %s472_s13 = sphi %s508_s13, %s638_s13   ;;  %s468_s12 = sphi %s506_s12, %s637_s12  }
   0x4   : > { %p23_p0 = scmp.ge.s32.totalorder %s22_s17, 2  ;;  %p395_p1 = scmp.ge.s32.totalorder %s484_s16, 1 }
   0x5   : > { %p157_p2 = scmp.lt.s32.totalorder %s484_s16, 5 }
   0x6   : > { %s642_s17 = smov (%p23_p0, %s22_s17), 0  ;;  %s644_s18 = smov (!%p23_p0, %s25_s18), %s480_s15 }
   0x7   : > { %p158_p3 = pnand %p395_p1, %p157_p2  ;;  %p27_p4 = scmp.ge.s32.totalorder %s644_s18, 2 }
   0x8   : > { %p189_p5 = scmp.lt.s32.totalorder (!%p158_p3), %s472_s13, 1  ;;  %p191_p6 = scmp.lt.s32.totalorder (!%p158_p3), %s468_s12, 1 }
   0x9   : > { %s646_s18 = smov (%p27_p4, %s644_s18), 0  ;;  %161 = sbr.rel (%p158_p3) target bundleno = 42 (0x2a), region = 32 }
   0xe   : > { %s648_s13 = smov (!%p189_p5, %s472_s13), 1  ;;  %s650_s12 = smov (!%p191_p6, %s468_s12), 1  ;;  %v444_v0 = vld [vmem:[%s634_s1] ss:$0 sm:$0xff]  ;;  %vm279_vm0 = vcmask 261120  }
   0xf   : > { %s397_s19 = sshll.u32 %s648_s13, 5  ;;  %s396_s20 = sshll.u32 %s650_s12, 4  ;;  %v547_v1 = vld [vmem:[%s635_s2] ss:$0 sm:$0xff] }
  0x10   : > { %s195_s21 = sadd.s32 %s397_s19, %s396_s20 }
  0x11   : > { %s398_s24 = sshll.u32 %s195_s21, 3 }
  0x12   : > { %s542_s27 = scalar_lea.vmem %s633_s0, %s398_s24  ;;  %s563_s5 = scalar_lea.vmem %s636_s3, %s398_s24 }
  0x13   : > { %v207_v2 = vld [vmem:[%s542_s27] sm:$0xff]  ;;  %v208_v3 = vld [vmem:[%s542_s27 + $0x8] sm:$0xff]  ;;  %v209_v4 = vld [vmem:[%s542_s27 + $0x10] sm:$0xff] }
  0x14   : > { %v227_v5 = vmul.f32 %v444_v0, %v207_v2  ;;  %v228_v6 = vmul.f32 %v444_v0, %v208_v3  ;;  %v229_v7 = vmul.f32 %v444_v0, %v209_v4  ;;  %v210_v8 = vld [vmem:[%s542_s27 + $0x18] sm:$0xff]  ;;  %v211_v9 = vld [vmem:[%s542_s27 + $0x20] sm:$0xff]  ;;  %v212_v10 = vld [vmem:[%s542_s27 + $0x28] sm:$0xff] }
  0x15   : > { %v230_v11 = vmul.f32 %v444_v0, %v210_v8  ;;  %v231_v12 = vmul.f32 %v444_v0, %v211_v9  ;;  %v232_v13 = vmul.f32 %v444_v0, %v212_v10  ;;  %v213_v14 = vld [vmem:[%s542_s27 + $0x30] sm:$0xff]  ;;  %v214_v15 = vld [vmem:[%s542_s27 + $0x38] sm:$0xff]  ;;  %v215_v24 = vld [vmem:[%s542_s27 + $0x40] sm:$0xff] }
  0x16   : > { %v247_v16 = vadd.f32 %v547_v1, %v227_v5  ;;  %v248_v17 = vadd.f32 %v547_v1, %v228_v6  ;;  %v249_v18 = vadd.f32 %v547_v1, %v229_v7  ;;  %v233_v19 = vmul.f32 %v444_v0, %v213_v14  ;;  %v216_v25 = vld [vmem:[%s542_s27 + $0x48] sm:$0xff]  ;;  %v217_v26 = vld [vmem:[%s542_s27 + $0x50] sm:$0xff]  ;;  %v218_v31 = vld [vmem:[%s542_s27 + $0x58] sm:$0xff] }
  0x17   : > { %v250_v20 = vadd.f32 %v547_v1, %v230_v11  ;;  %v251_v21 = vadd.f32 %v547_v1, %v231_v12  ;;  %v252_v22 = vadd.f32 %v547_v1, %v232_v13  ;;  %v234_v23 = vmul.f32 %v444_v0, %v214_v15  ;;  %v219_v32 = vld [vmem:[%s542_s27 + $0x60] sm:$0xff]  ;;  %v220_v33 = vld [vmem:[%s542_s27 + $0x68] sm:$0xff]  ;;  %v221_v37 = vld [vmem:[%s542_s27 + $0x70] sm:$0xff] }
  0x18   : > { %v263_v27 = vmax.f32 %v247_v16, 0.0  ;;  %v264_v28 = vmax.f32 %v248_v17, 0.0  ;;  %v265_v29 = vmax.f32 %v249_v18, 0.0  ;;  %v253_v30 = vadd.f32 %v547_v1, %v233_v19  ;;  %v222_v42 = vld [vmem:[%s542_s27 + $0x78] sm:$0xff] }
  0x19   : > { %v266_v34 = vmax.f32 %v250_v20, 0.0  ;;  %v267_v35 = vmax.f32 %v251_v21, 0.0  ;;  %v254_v36 = vadd.f32 %v547_v1, %v234_v23  ;;  %v268_v38 = vmax.f32 %v252_v22, 0.0 }
  0x1a   : > { %280 = vst.msk [vmem:[%s563_s5] sm:$0xff] %vm279_vm0, %v263_v27  ;;  %v235_v39 = vmul.f32 %v444_v0, %v215_v24  ;;  %v236_v40 = vmul.f32 %v444_v0, %v216_v25  ;;  %v237_v41 = vmul.f32 %v444_v0, %v217_v26  ;;  %v269_v43 = vmax.f32 %v253_v30, 0.0 }
  0x1b   : > { %281 = vst.msk [vmem:[%s563_s5 + $0x8] sm:$0xff] %vm279_vm0, %v264_v28  ;;  %v238_v44 = vmul.f32 %v444_v0, %v218_v31  ;;  %v239_v45 = vmul.f32 %v444_v0, %v219_v32  ;;  %v240_v46 = vmul.f32 %v444_v0, %v220_v33  ;;  %v241_v50 = vmul.f32 %v444_v0, %v221_v37 }
  0x1c   : > { %282 = vst.msk [vmem:[%s563_s5 + $0x10] sm:$0xff] %vm279_vm0, %v265_v29  ;;  %v255_v47 = vadd.f32 %v547_v1, %v235_v39  ;;  %v256_v48 = vadd.f32 %v547_v1, %v236_v40  ;;  %v257_v49 = vadd.f32 %v547_v1, %v237_v41  ;;  %v270_v51 = vmax.f32 %v254_v36, 0.0 }
  0x1d   : > { %283 = vst.msk [vmem:[%s563_s5 + $0x18] sm:$0xff] %vm279_vm0, %v266_v34  ;;  %v258_v52 = vadd.f32 %v547_v1, %v238_v44  ;;  %v242_v53 = vmul.f32 %v444_v0, %v222_v42  ;;  %v259_v55 = vadd.f32 %v547_v1, %v239_v45  ;;  %v260_v57 = vadd.f32 %v547_v1, %v240_v46 }
  0x1e   : > { %284 = vst.msk [vmem:[%s563_s5 + $0x20] sm:$0xff] %vm279_vm0, %v267_v35  ;;  %v271_v54 = vmax.f32 %v255_v47, 0.0  ;;  %v272_v56 = vmax.f32 %v256_v48, 0.0  ;;  %v273_v58 = vmax.f32 %v257_v49, 0.0  ;;  %v261_v59 = vadd.f32 %v547_v1, %v241_v50 }
  0x1f   : > { %285 = vst.msk [vmem:[%s563_s5 + $0x28] sm:$0xff] %vm279_vm0, %v268_v38  ;;  %v274_v60 = vmax.f32 %v258_v52, 0.0  ;;  %v262_v61 = vadd.f32 %v547_v1, %v242_v53  ;;  %v275_v62 = vmax.f32 %v259_v55, 0.0  ;;  %v276_v63 = vmax.f32 %v260_v57, 0.0 }
  0x20   : > { %286 = vst.msk [vmem:[%s563_s5 + $0x30] sm:$0xff] %vm279_vm0, %v269_v43  ;;  %v277_v0 = vmax.f32 %v261_v59, 0.0 }
  0x21   : > { %287 = vst.msk [vmem:[%s563_s5 + $0x38] sm:$0xff] %vm279_vm0, %v270_v51  ;;  %v278_v2 = vmax.f32 %v262_v61, 0.0 }
  0x22   : > { %288 = vst.msk [vmem:[%s563_s5 + $0x40] sm:$0xff] %vm279_vm0, %v271_v54 }
  0x23   : > { %289 = vst.msk [vmem:[%s563_s5 + $0x48] sm:$0xff] %vm279_vm0, %v272_v56 }
  0x24   : > { %290 = vst.msk [vmem:[%s563_s5 + $0x50] sm:$0xff] %vm279_vm0, %v273_v58 }
  0x25   : > { %291 = vst.msk [vmem:[%s563_s5 + $0x58] sm:$0xff] %vm279_vm0, %v274_v60 }
  0x26   : > { %292 = vst.msk [vmem:[%s563_s5 + $0x60] sm:$0xff] %vm279_vm0, %v275_v62 }
  0x27   : > { %293 = vst.msk [vmem:[%s563_s5 + $0x68] sm:$0xff] %vm279_vm0, %v276_v63 }
  0x28   : > { %294 = vst.msk [vmem:[%s563_s5 + $0x70] sm:$0xff] %vm279_vm0, %v277_v0 }
  0x29   : > { %295 = vst.msk [vmem:[%s563_s5 + $0x78] sm:$0xff] %vm279_vm0, %v278_v2 }
  0x2a PF: > { %s13_s16 = sadd.s32 1, %s484_s16   ;;  %s637_s12 = smov %s476_s14 }
  0x2b   : > { %p10_p7 = scmp.ge.s32.totalorder %s13_s16, 6   ;;  %s638_s13 = smov %s480_s15 }
  0x2c   : > { %s639_s14 = smov %s642_s17  ;;  %s640_s15 = smov %s646_s18 }
  0x2d   :  { %12 = sbr.rel (!%p10_p7) target bundleno = 3 (0x3), region = 62 }

// kernel: up_conv_forward.2
= control target key start
LH: loop header
LB: loop body
LE: loop exit
PB: predicated region body
PF: predicated region fallthrough
CT: control target
= control target key end

     0   :  { %s2027_s18 = smov 0   ;;  %s2029_s19 = smov 0   ;;  %s2785_s0 = inlined_call_operand.vmem [shape: f32[2,18,18,4], index: 0, kind: input, shape index: {}, may-alias: {0,1,2}]   ;;  %s2786_s1 = inlined_call_operand.vmem [shape: f32[2,18,18,4], index: 1, kind: input, shape index: {}, may-alias: {0,1,2}]   ;;  %s2787_s2 = inlined_call_operand.vmem [shape: f32[2,18,18,4], index: 2, kind: input, shape index: {}, may-alias: {0,1,2}]   ;;  %s2788_s3 = inlined_call_operand.vmem [shape: f32[9,4,32], index: 3, kind: input, shape index: {}]   ;;  %s2789_s4 = inlined_call_operand.vmem [shape: f32[2,2,128,32], index: 4, kind: output, shape index: {0}]   ;;  %s2790_s5 = inlined_call_operand.vmem [shape: f32[2,2,2,32], index: 5, kind: output, shape index: {1}]  }
   0x1   :  { %s2031_s20 = smov 0   ;;  %s2033_s21 = smov 0  }
   0x2   :  { %s2035_s22 = smov 0  }
   0x3 LB: > { %s25_s23 = sadd.s32 1, %s1987_s20  ;;  %s28_s24 = sadd.s32 1, %s1991_s21  ;;  %s1995_s22 = sphi %s2035_s22, %s16_s22   ;;  %s1991_s21 = sphi %s2033_s21, %s2803_s21   ;;  %s1987_s20 = sphi %s2031_s20, %s2802_s20   ;;  %s1983_s19 = sphi %s2029_s19, %s2801_s19   ;;  %s1979_s18 = sphi %s2027_s18, %s2800_s18  }
   0x4   : > { %p26_p0 = scmp.ge.s32.totalorder %s25_s23, 2  ;;  %p1735_p1 = scmp.ge.s32.totalorder %s1995_s22, 1 }
   0x5   : > { %p272_p2 = scmp.lt.s32.totalorder %s1995_s22, 5 }
   0x6   : > { %s2805_s23 = smov (%p26_p0, %s25_s23), 0  ;;  %s2807_s24 = smov (!%p26_p0, %s28_s24), %s1991_s21 }
   0x7   : > { %p273_p3 = pnand %p1735_p1, %p272_p2  ;;  %p30_p4 = scmp.ge.s32.totalorder %s2807_s24, 2 }
   0x9   : > { %s2809_s24 = smov (%p30_p4, %s2807_s24), 0  ;;  %276 = sbr.rel (%p273_p3) target bundleno = 465 (0x1d1), region = 36 }
   0xe   : > { %v1747_v0 = vld [vmem:[%s2788_s3 + $0x4] sm:$0xf]  ;;  %vm539_vm0 = vcmask 1043456   ;;  %s2063_s27 = sshll.u32 %s1979_s18, 3  ;;  %p350_p5 = scmp.lt.s32.totalorder %s1983_s19, 1  ;;  %vm463_vm1 = vcmask 1046528  }
   0xf   : > { %1910 = vmatpush.msk.msra.mxu1 %vm539_vm0, %v1747_v0  ;;  %1911 = vmatpush.msk.msra.mxu2 %vm539_vm0, %v1747_v0  ;;  %p352_p6 = scmp.lt.s32.totalorder %s2063_s27, 17  ;;  %v1782_v1 = vld [vmem:[%s2788_s3 + $0x8] sm:$0xf]  ;;  %v1800_v2 = vld [vmem:[%s2788_s3 + $0xc] sm:$0xf]  ;;  %vm506_vm2 = vcmask 31744  }
  0x10   : > { %s2811_s19 = smov (!%p350_p5, %s1983_s19), 1  ;;  %1912 = vmatpush.msk.msra.mxu3 %vm539_vm0, %v1747_v0  ;;  %v438_v3 = vld [vmem:[%s2788_s3] sm:$0xf]  ;;  %v1818_v4 = vld [vmem:[%s2788_s3 + $0x10] sm:$0xf]  ;;  %1748 = vmatpush.msk.msra.mxu0 %vm539_vm0, %v1747_v0  ;;  %vm708_vm3 = vcmask 1045504  }
  0x11   : > { %1783 = vmatpush.msk.msrb.mxu2 %vm539_vm0, %v1782_v1  ;;  %s353_s11 = scalar_select %p352_p6, %s2063_s27, 17  ;;  %1765 = vmatpush.msk.msrb.mxu1 %vm539_vm0, %v438_v3  ;;  %v1854_v36 = vld [vmem:[%s2788_s3 + $0x18] sm:$0xf]  ;;  %v1872_v41 = vld [vmem:[%s2788_s3 + $0x1c] sm:$0xf]  ;;  %vm1433_vm4 = vcmask 261120  }
  0x12   : > { %1801 = vmatpush.msk.msrb.mxu3 %vm539_vm0, %v1800_v2  ;;  %s2088_s12 = smul.u32 54, %s2811_s19  ;;  %1819 = vmatpush.msk.msrb.mxu0 %vm539_vm0, %v1818_v4  ;;  %v1836_v44 = vld [vmem:[%s2788_s3 + $0x14] sm:$0xf]  ;;  %v1890_v50 = vld [vmem:[%s2788_s3 + $0x20] sm:$0xf]  ;;  %s366_s10 = sadd.s32 8, %s2063_s27 }
  0x13   : > { %s1913_s13 = smul.u32 3, %s353_s11  ;;  %p369_p7 = scmp.lt.s32.totalorder %s366_s10, 17  ;;  %vm1471_vm5 = vcmask 253952  }
  0x14   : > { %p393_p9 = scmp.lt.s32.totalorder %s1979_s18, 1  ;;  %s1743_s7 = sshll.u32 %s2811_s19, 5 }
  0x15   : > { %s356_s14 = sadd.s32 %s2088_s12, %s1913_s13  ;;  %s2813_s10 = smov (!%p369_p7, %s366_s10), 17 }
  0x16   : > { %s1737_s15 = sshll.u32 %s356_s14, 3  ;;  %s1915_s11 = smul.u32 3, %s2813_s10 }
  0x17   : > { %s2096_s25 = scalar_lea.vmem %s2785_s0, %s1737_s15  ;;  %s2817_s18 = smov (!%p393_p9, %s1979_s18), 1 }
  0x18   : > { %v2099_v5 = vld [vmem:[%s2096_s25 + $0x30] sm:$0xff]  ;;  %v2102_v6 = vld [vmem:[%s2096_s25 + $0x38] sm:$0xff]  ;;  %v2105_v7 = vld [vmem:[%s2096_s25 + $0x60] sm:$0xff]  ;;  %s373_s13 = sadd.s32 %s1915_s11, %s2088_s12  ;;  %s1742_s6 = sshll.u32 %s2817_s18, 4 }
  0x19   : > { %v474_v8 = vrot.slane %v2099_v5, 1  ;;  %v475_v9 = vrot.slane %v2102_v6, 1  ;;  %v2110_v10 = vld [vmem:[%s2096_s25 + $0x68] sm:$0xff]  ;;  %v484_v11 = vrot.slane %v2105_v7, 1  ;;  %v2114_v12 = vld [vmem:[%s2096_s25 + $0x90] sm:$0xff]  ;;  %v2117_v13 = vld [vmem:[%s2096_s25 + $0x98] sm:$0xff]  ;;  %s397_s8 = sadd.s32 %s1743_s7, %s1742_s6 }
  0x1a   : > { %v485_v14 = vrot.slane %v2110_v10, 1  ;;  %v494_v15 = vrot.slane %v2114_v12, 1  ;;  %v495_v16 = vrot.slane %v2117_v13, 1  ;;  %v2123_v17 = vld [vmem:[%s2096_s25 + $0x40] sm:$0x3]  ;;  %v2135_v21 = vld [vmem:[%s2096_s25 + $0x8] sm:$0xff] }
  0x1b   : > { %v2126_v18 = vld [vmem:[%s2096_s25] sm:$0xff]  ;;  %v2129_v19 = vsel %vm463_vm1, %v474_v8, %v475_v9  ;;  %v2132_v20 = vld [vmem:[%s2096_s25 + $0x70] sm:$0x3]  ;;  %v465_v25 = vrot.slane %v2135_v21, 1  ;;  %v477_v27 = vrot.slane %v2123_v17, 1  ;;  %v2167_v34 = vld [vmem:[%s2096_s25 + $0x48] sm:$0xff] }
  0x1c   : > { %v464_v22 = vrot.slane %v2126_v18, 1  ;;  %1753 = vmatmul.msk.f32.vlgmr.msra.gmra.mxu1 %vm506_vm2, %v2129_v19  ;;  %v2141_v23 = vsel %vm463_vm1, %v484_v11, %v485_v14  ;;  %v2144_v24 = vsel %vm463_vm1, %v494_v15, %v495_v16  ;;  %v2148_v26 = vld [vmem:[%s2096_s25 + $0xa0] sm:$0x3]  ;;  %v2156_v28 = vld [vmem:[%s2096_s25 + $0x10] sm:$0x3]  ;;  %v487_v29 = vrot.slane %v2132_v20, 1 }
  0x1d   : > { %1757 = vmatmul.msk.f32.vlgmr.msra.gmra.mxu2 %vm506_vm2, %v2141_v23  ;;  %1761 = vmatmul.msk.f32.vlgmr.msra.gmra.mxu3 %vm506_vm2, %v2144_v24  ;;  %v497_v31 = vrot.slane %v2148_v26, 1  ;;  %v467_v32 = vrot.slane %v2156_v28, 1  ;;  %v2164_v33 = vsel %vm463_vm1, %v475_v9, %v477_v27  ;;  %v2170_v35 = vld [vmem:[%s2096_s25 + $0x50] sm:$0xff]  ;;  %v2182_v39 = vld [vmem:[%s2096_s25 + $0x78] sm:$0xff]  ;;  %v2185_v40 = vld [vmem:[%s2096_s25 + $0x80] sm:$0xff]  ;;  %v479_v46 = vrot.slane %v2167_v34, 1 }
  0x1e   : > { %v466_v30 = vsel %vm463_vm1, %v464_v22, %v465_v25  ;;  %v2176_v37 = vsel %vm463_vm1, %v485_v14, %v487_v29  ;;  %1855 = vmatpush.msk.msra.mxu2 %vm539_vm0, %v1854_v36  ;;  %v2192_v42 = vld [vmem:[%s2096_s25 + $0xa8] sm:$0xff]  ;;  %v2195_v43 = vld [vmem:[%s2096_s25 + $0xb0] sm:$0xff]  ;;  %1873 = vmatpush.msk.msra.mxu3 %vm539_vm0, %v1872_v41  ;;  %v480_v47 = vrot.slane %v2170_v35, 1  ;;  %v411_v48 = vld [vmem:[%s2096_s25 + $0x18] sm:$0xff]  ;;  %v489_v51 = vrot.slane %v2182_v39, 1  ;;  %s1739_s14 = sshll.u32 %s373_s13, 3 }
  0x1f   : > { %1749 = vmatmul.msk.f32.vlgmr.msra.gmra.mxu0 %vm506_vm2, %v466_v30  ;;  %v2179_v38 = vsel %vm463_vm1, %v495_v16, %v497_v31  ;;  %v468_v45 = vsel %vm463_vm1, %v465_v25, %v467_v32  ;;  %v412_v49 = vld [vmem:[%s2096_s25 + $0x20] sm:$0xff]  ;;  %v490_v52 = vrot.slane %v2185_v40, 1  ;;  %v499_v53 = vrot.slane %v2192_v42, 1  ;;  %1837 = vmatpush.msk.msra.mxu1 %vm539_vm0, %v1836_v44  ;;  %v2232_v60 = vld [vmem:[%s2096_s25 + $0x58] sm:$0x3]  ;;  %s375_s17 = scalar_lea.vmem %s2786_s1, %s1739_s14  ;;  %s1744_s9 = sshll.u32 %s397_s8, 3 }
  0x20   : > { %v500_v54 = vrot.slane %v2195_v43, 1  ;;  %1891 = vmatpush.msk.msra.mxu0 %vm539_vm0, %v1890_v50  ;;  %v469_v55 = vrot.slane %v411_v48, 1  ;;  %v470_v56 = vrot.slane %v412_v49, 1  ;;  %v2223_v57 = vsel %vm463_vm1, %v479_v46, %v480_v47  ;;  %v2235_v61 = vld [vmem:[%s2096_s25 + $0x88] sm:$0x3]  ;;  %s2684_s13 = scalar_lea.vmem %s2789_s4, %s1744_s9  ;;  %s1745_s14 = sshll.u32 %s2811_s19, 1 }
  0x21   : > { %v2226_v58 = vsel %vm463_vm1, %v489_v51, %v490_v52  ;;  %v2238_v62 = vld [vmem:[%s2096_s25 + $0xb8] sm:$0x3]  ;;  %v482_v0 = vrot.slane %v2232_v60, 1  ;;  %v413_v1 = vld [vmem:[%s2096_s25 + $0x28] sm:$0x3]  ;;  %v492_v2 = vrot.slane %v2235_v61, 1  ;;  %s405_s15 = sadd.s32 %s1745_s14, %s2817_s18 }
  0x22   : > { %v2229_v59 = vsel %vm463_vm1, %v499_v53, %v500_v54  ;;  %v471_v63 = vsel %vm463_vm1, %v469_v55, %v470_v56  ;;  %v502_v3 = vrot.slane %v2238_v62, 1  ;;  %v472_v4 = vrot.slane %v413_v1, 1  ;;  %s379_s25 = sadd.s32 9, %s2063_s27  ;;  %s1746_s16 = sshll.u32 %s405_s15, 1 }
  0x23   : > { %v2253_v8 = vsel %vm463_vm1, %v480_v47, %v482_v0  ;;  %v2256_v9 = vsel %vm463_vm1, %v490_v52, %v492_v2  ;;  %v709_v15 = vrot.slane %v2126_v18, 2  ;;  %v710_v16 = vrot.slane %v2135_v21, 2  ;;  %p382_p8 = scmp.lt.s32.totalorder %s379_s25, 17 }
  0x24   : > { %1754 = vmatmul.msk.f32.gmra.mxu1 %vm506_vm2, %v2164_v33  ;;  %v2259_v11 = vsel %vm463_vm1, %v500_v54, %v502_v3  ;;  %v473_v14 = vsel %vm463_vm1, %v470_v56, %v472_v4  ;;  %v712_v25 = vrot.slane %v2156_v28, 2  ;;  %v714_v29 = vrot.slane %v411_v48, 2 }
  0x25   : > { %1758 = vmatmul.msk.f32.gmra.mxu2 %vm506_vm2, %v2176_v37  ;;  %1762 = vmatmul.msk.f32.gmra.mxu3 %vm506_vm2, %v2179_v38  ;;  %v711_v22 = vsel %vm708_vm3, %v709_v15, %v710_v16  ;;  %v715_v30 = vrot.slane %v412_v49, 2  ;;  %v719_v31 = vrot.slane %v2099_v5, 2  ;;  %v720_v32 = vrot.slane %v2102_v6, 2  ;;  %s2815_s25 = smov (!%p382_p8, %s379_s25), 17 }
  0x26   : > { %v713_v27 = vsel %vm708_vm3, %v710_v16, %v712_v25  ;;  %v722_v41 = vrot.slane %v2123_v17, 2  ;;  %v725_v46 = vrot.slane %v2170_v35, 2  ;;  %v727_v47 = vrot.slane %v2232_v60, 2  ;;  %s1916_s27 = smul.u32 3, %s2815_s25 }
  0x27   : > { %1750 = vmatmul.msk.f32.gmra.mxu0 %vm506_vm2, %v468_v45  ;;  %v2307_v36 = vsel %vm708_vm3, %v719_v31, %v720_v32  ;;  %v724_v45 = vrot.slane %v2167_v34, 2  ;;  %v730_v50 = vrot.slane %v2110_v10, 2  ;;  %v732_v52 = vrot.slane %v2132_v20, 2 }
  0x28   : > { %v2319_v44 = vsel %vm708_vm3, %v720_v32, %v722_v41  ;;  %v734_v54 = vrot.slane %v2182_v39, 2  ;;  %v735_v55 = vrot.slane %v2185_v40, 2  ;;  %v737_v56 = vrot.slane %v2235_v61, 2  ;;  %s386_s26 = sadd.s32 %s1916_s27, %s2088_s12  ;;  %s407_s27 = scalar_lea.vmem %s2790_s5, %s1746_s16 }
  0x29   : > { %v2332_v17 = vsel %vm708_vm3, %v724_v45, %v725_v46  ;;  %v2369_v53 = vsel %vm708_vm3, %v730_v50, %v732_v52  ;;  %v739_v61 = vrot.slane %v2114_v12, 2  ;;  %v742_v3 = vrot.slane %v2148_v26, 2  ;;  %v2440_v26 = vld [vmem:[%s375_s17 + $0x8] sm:$0xff]  ;;  %s1741_s28 = sshll.u32 %s386_s26, 3 }
  0x2a   : > { %v2382_v20 = vsel %vm708_vm3, %v734_v54, %v735_v55  ;;  %v2395_v60 = vsel %vm708_vm3, %v735_v55, %v737_v56  ;;  %v744_v25 = vrot.slane %v2192_v42, 2  ;;  %v961_v32 = vrot.slane %v2440_v26, 1  ;;  %s388_s30 = scalar_lea.vmem %s2787_s2, %s1741_s28 }
  0x2c   : > { %1755 = vmatmul.msk.f32.gmra.mxu1 %vm506_vm2, %v2223_v57 }
  0x2d   : > { %1759 = vmatmul.msk.f32.gmra.mxu2 %vm506_vm2, %v2226_v58  ;;  %1763 = vmatmul.msk.f32.gmra.mxu3 %vm506_vm2, %v2229_v59 }
  0x2f   : > { %1751 = vmatmul.msk.f32.gmra.mxu0 %vm506_vm2, %v471_v63 }
  0x34   : > { %1756 = vmatmul.msk.f32.gmra.mxu1 %vm506_vm2, %v2253_v8 }
  0x35   : > { %1760 = vmatmul.msk.f32.gmra.mxu2 %vm506_vm2, %v2256_v9  ;;  %1764 = vmatmul.msk.f32.gmra.mxu3 %vm506_vm2, %v2259_v11 }
  0x37   : > { %1752 = vmatmul.msk.f32.gmra.mxu0 %vm506_vm2, %v473_v14 }
  0x3c   : > { %1766 = vmatmul.msk.f32.vlgmr.msrb.gmra.mxu1 %vm506_vm2, %v2126_v18  ;;  %v2285_v18 = vsel %vm708_vm3, %v714_v29, %v715_v30  ;;  %v2444_v29 = vld [vmem:[%s375_s17] sm:$0xff] }
  0x3d   : > { %1784 = vmatmul.msk.f32.vlgmr.msrb.gmra.mxu2 %vm506_vm2, %v711_v22  ;;  %1802 = vmatmul.msk.f32.vlgmr.msrb.gmra.mxu3 %vm506_vm2, %v411_v48  ;;  %v960_v31 = vrot.slane %v2444_v29, 1 }
  0x3f   : > { %1820 = vmatmul.msk.f32.vlgmr.msrb.gmra.mxu0 %vm506_vm2, %v471_v63  ;;  %v740_v63 = vrot.slane %v2117_v13, 2 }
  0x41   : > { %v2429_v16 = vsel %vm708_vm3, %v740_v63, %v742_v3 }
  0x44   : > { %1767 = vmatmul.msk.f32.gmra.mxu1 %vm506_vm2, %v2135_v21  ;;  %v717_v21 = vrot.slane %v413_v1, 2  ;;  %v2410_v1 = vsel %vm708_vm3, %v739_v61, %v740_v63 }
  0x45   : > { %1785 = vmatmul.msk.f32.gmra.mxu2 %vm506_vm2, %v713_v27  ;;  %1803 = vmatmul.msk.f32.gmra.mxu3 %vm506_vm2, %v412_v49  ;;  %v745_v27 = vrot.slane %v2195_v43, 2 }
  0x46   : > { %v2295_v28 = vsel %vm708_vm3, %v715_v30, %v717_v21 }
  0x47   : > { %1821 = vmatmul.msk.f32.gmra.mxu0 %vm506_vm2, %v473_v14  ;;  %v2457_v45 = vsel %vm708_vm3, %v744_v25, %v745_v27 }
  0x4c   : > { %1768 = vmatmul.msk.f32.gmra.mxu1 %vm506_vm2, %v411_v48  ;;  %v2344_v48 = vsel %vm708_vm3, %v725_v46, %v727_v47  ;;  %v2462_v47 = vsel %vm463_vm1, %v960_v31, %v961_v32 }
  0x4d   : > { %1786 = vmatmul.msk.f32.gmra.mxu2 %vm506_vm2, %v2285_v18  ;;  %1804 = vmatmul.msk.f32.gmra.mxu3 %vm506_vm2, %v2099_v5 }
  0x4f   : > { %1822 = vmatmul.msk.f32.gmra.mxu0 %vm506_vm2, %v2129_v19 }
  0x54   : > { %1769 = vmatmul.msk.f32.gmra.mxu1 %vm506_vm2, %v412_v49  ;;  %v729_v49 = vrot.slane %v2105_v7, 2 }
  0x55   : > { %1787 = vmatmul.msk.f32.gmra.mxu2 %vm506_vm2, %v2295_v28  ;;  %1805 = vmatmul.msk.f32.gmra.mxu3 %vm506_vm2, %v2102_v6 }
  0x56   : > { %v2357_v51 = vsel %vm708_vm3, %v729_v49, %v730_v50  ;;  %v2468_v49 = vld [vmem:[%s375_s17 + $0x10] sm:$0x3]  ;;  %v747_v50 = vrot.slane %v2238_v62, 2 }
  0x57   : > { %1823 = vmatmul.msk.f32.gmra.mxu0 %vm506_vm2, %v2164_v33  ;;  %v963_v55 = vrot.slane %v2468_v49, 1 }
  0x58   : > { %v2481_v61 = vsel %vm708_vm3, %v745_v27, %v747_v50 }
  0x59   : > { %v2486_v62 = vsel %vm463_vm1, %v961_v32, %v963_v55 }
  0x5a   : > { %2794 = vst [vmem:[#allocation4_spill] sm:$0xff] %v2486_v62 }
  0x5c   : > { %1770 = vmatmul.msk.f32.gmra.mxu1 %vm506_vm2, %v2099_v5 }
  0x5d   : > { %1788 = vmatmul.msk.f32.gmra.mxu2 %vm506_vm2, %v2307_v36  ;;  %1806 = vmatmul.msk.f32.gmra.mxu3 %vm506_vm2, %v2167_v34 }
  0x5f   : > { %1824 = vmatmul.msk.f32.gmra.mxu0 %vm506_vm2, %v2223_v57 }
  0x64   : > { %1771 = vmatmul.msk.f32.gmra.mxu1 %vm506_vm2, %v2102_v6 }
  0x65   : > { %1789 = vmatmul.msk.f32.gmra.mxu2 %vm506_vm2, %v2319_v44  ;;  %1807 = vmatmul.msk.f32.gmra.mxu3 %vm506_vm2, %v2170_v35 }
  0x67   : > { %1825 = vmatmul.msk.f32.gmra.mxu0 %vm506_vm2, %v2253_v8 }
  0x6c   : > { %1772 = vmatmul.msk.f32.gmra.mxu1 %vm506_vm2, %v2167_v34 }
  0x6d   : > { %1790 = vmatmul.msk.f32.gmra.mxu2 %vm506_vm2, %v2332_v17  ;;  %1808 = vmatmul.msk.f32.gmra.mxu3 %vm506_vm2, %v2105_v7 }
  0x6f   : > { %1826 = vmatmul.msk.f32.gmra.mxu0 %vm506_vm2, %v2141_v23 }
  0x74   : > { %1773 = vmatmul.msk.f32.gmra.mxu1 %vm506_vm2, %v2170_v35 }
  0x75   : > { %1791 = vmatmul.msk.f32.gmra.mxu2 %vm506_vm2, %v2344_v48  ;;  %1809 = vmatmul.msk.f32.gmra.mxu3 %vm506_vm2, %v2110_v10 }
  0x77   : > { %1827 = vmatmul.msk.f32.gmra.mxu0 %vm506_vm2, %v2176_v37 }
  0x7c   : > { %1774 = vmatmul.msk.f32.gmra.mxu1 %vm506_vm2, %v2105_v7 }
  0x7d   : > { %1792 = vmatmul.msk.f32.gmra.mxu2 %vm506_vm2, %v2357_v51  ;;  %1810 = vmatmul.msk.f32.gmra.mxu3 %vm506_vm2, %v2182_v39 }
  0x7f   : > { %1828 = vmatmul.msk.f32.gmra.mxu0 %vm506_vm2, %v2226_v58 }
  0x84   : > { %1775 = vmatmul.msk.f32.gmra.mxu1 %vm506_vm2, %v2110_v10 }
  0x85   : > { %1793 = vmatmul.msk.f32.gmra.mxu2 %vm506_vm2, %v2369_v53  ;;  %1811 = vmatmul.msk.f32.gmra.mxu3 %vm506_vm2, %v2185_v40 }
  0x87   : > { %1829 = vmatmul.msk.f32.gmra.mxu0 %vm506_vm2, %v2256_v9 }
  0x8c   : > { %1776 = vmatmul.msk.f32.gmra.mxu1 %vm506_vm2, %v2182_v39 }
  0x8d   : > { %1794 = vmatmul.msk.f32.gmra.mxu2 %vm506_vm2, %v2382_v20  ;;  %1812 = vmatmul.msk.f32.gmra.mxu3 %vm506_vm2, %v2114_v12 }
  0x8f   : > { %1830 = vmatmul.msk.f32.gmra.mxu0 %vm506_vm2, %v2144_v24 }
  0x94   : > { %1777 = vmatmul.msk.f32.gmra.mxu1 %vm506_vm2, %v2185_v40 }
  0x95   : > { %1795 = vmatmul.msk.f32.gmra.mxu2 %vm506_vm2, %v2395_v60  ;;  %1813 = vmatmul.msk.f32.gmra.mxu3 %vm506_vm2, %v2117_v13 }
  0x97   : > { %1831 = vmatmul.msk.f32.gmra.mxu0 %vm506_vm2, %v2179_v38 }
  0x99   : > { %v2407_v0 = vpop.f32.mrf.mxu1 }
  0x9c   : > { %1778 = vmatmul.msk.f32.gmra.mxu1 %vm506_vm2, %v2114_v12  ;;  %v560_v2 = vpop.f32.mrf.mxu0 }
  0x9d   : > { %1796 = vmatmul.msk.f32.gmra.mxu2 %vm506_vm2, %v2410_v1  ;;  %1814 = vmatmul.msk.f32.gmra.mxu3 %vm506_vm2, %v2192_v42 }
  0x9f   : > { %1832 = vmatmul.msk.f32.gmra.mxu0 %vm506_vm2, %v2229_v59 }
  0xa0   : > { %v2422_v4 = vpop.f32.mrf.mxu2  ;;  %v2424_v14 = vpop.f32.mrf.mxu3 }
  0xa1   : > { %v2426_v15 = vpop.f32.mrf.mxu1 }
  0xa4   : > { %1779 = vmatmul.msk.f32.gmra.mxu1 %vm506_vm2, %v2117_v13  ;;  %v563_v22 = vpop.f32.mrf.mxu0 }
  0xa5   : > { %1797 = vmatmul.msk.f32.gmra.mxu2 %vm506_vm2, %v2429_v16  ;;  %1815 = vmatmul.msk.f32.gmra.mxu3 %vm506_vm2, %v2195_v43 }
  0xa7   : > { %1833 = vmatmul.msk.f32.gmra.mxu0 %vm506_vm2, %v2259_v11 }
  0xa8   : > { %v2448_v30 = vpop.f32.mrf.mxu2  ;;  %v2450_v21 = vpop.f32.mrf.mxu3 }
  0xa9   : > { %2792 = vst [vmem:[#allocation2_spill] sm:$0xff] %v2450_v21  ;;  %v2454_v41 = vpop.f32.mrf.mxu1 }
  0xac   : > { %1780 = vmatmul.msk.f32.gmra.mxu1 %vm506_vm2, %v2192_v42  ;;  %v566_v46 = vpop.f32.mrf.mxu0 }
  0xad   : > { %1798 = vmatmul.msk.f32.gmra.mxu2 %vm506_vm2, %v2457_v45  ;;  %1816 = vmatmul.msk.f32.gmra.mxu3 %vm506_vm2, %v2444_v29 }
  0xaf   : > { %1834 = vmatmul.msk.f32.gmra.mxu0 %vm506_vm2, %v2462_v47 }
  0xb0   : > { %v2473_v52 = vpop.f32.mrf.mxu2  ;;  %v2475_v54 = vpop.f32.mrf.mxu3 }
  0xb1   : > { %2793 = vst [vmem:[#allocation3_spill] sm:$0xff] %v2475_v54  ;;  %v2478_v56 = vpop.f32.mrf.mxu1 }
  0xb4   : > { %1781 = vmatmul.msk.f32.gmra.mxu1 %vm506_vm2, %v2195_v43  ;;  %v569_v63 = vpop.f32.mrf.mxu0 }
  0xb5   : > { %1799 = vmatmul.msk.f32.gmra.mxu2 %vm506_vm2, %v2481_v61  ;;  %1817 = vmatmul.msk.f32.gmra.mxu3 %vm506_vm2, %v2440_v26 }
  0xb7   : > { %1835 = vmatmul.msk.f32.gmra.mxu0 %vm506_vm2, %v2486_v62 }
  0xb8   : > { %v2494_v3 = vpop.f32.mrf.mxu2  ;;  %v2496_v25 = vpop.f32.mrf.mxu3 }
  0xb9   : > { %2795 = vst [vmem:[#allocation5_spill] sm:$0xff] %v2496_v25  ;;  %v660_v27 = vpop.f32.mrf.mxu1 }
  0xba   : > { %v661_v32 = vadd.f32 %v660_v27, %v560_v2 }
  0xbc   : > { %1838 = vmatmul.msk.f32.vlgmr.msra.gmra.mxu1 %vm506_vm2, %v2285_v18  ;;  %v991_v31 = vpop.f32.mrf.mxu0 }
  0xbd   : > { %1856 = vmatmul.msk.f32.vlgmr.msra.gmra.mxu2 %vm506_vm2, %v2099_v5  ;;  %1874 = vmatmul.msk.f32.vlgmr.msra.gmra.mxu3 %vm506_vm2, %v2129_v19 }
  0xbf   : > { %1892 = vmatmul.msk.f32.vlgmr.msra.gmra.mxu0 %vm506_vm2, %v2307_v36 }
  0xc0   : > { %v803_v50 = vpop.f32.mrf.mxu2  ;;  %v895_v55 = vpop.f32.mrf.mxu3 }
  0xc1   : > { %v851_v54 = vadd.f32 %v803_v50, %v661_v32  ;;  %v663_v21 = vpop.f32.mrf.mxu1 }
  0xc2   : > { %v664_v5 = vadd.f32 %v663_v21, %v563_v22 }
  0xc3   : > { %v943_v25 = vadd.f32 %v895_v55, %v851_v54 }
  0xc4   : > { %1839 = vmatmul.msk.f32.gmra.mxu1 %vm506_vm2, %v2295_v28  ;;  %v994_v18 = vpop.f32.mrf.mxu0 }
  0xc5   : > { %v2508_v62 = vadd.f32 %v991_v31, %v943_v25  ;;  %1857 = vmatmul.msk.f32.gmra.mxu2 %vm506_vm2, %v2102_v6  ;;  %1875 = vmatmul.msk.f32.gmra.mxu3 %vm506_vm2, %v2164_v33 }
  0xc7   : > { %1893 = vmatmul.msk.f32.gmra.mxu0 %vm506_vm2, %v2319_v44 }
  0xc8   : > { %v806_v19 = vpop.f32.mrf.mxu2  ;;  %v898_v2 = vpop.f32.mrf.mxu3 }
  0xc9   : > { %v852_v27 = vadd.f32 %v806_v19, %v664_v5  ;;  %v666_v54 = vpop.f32.mrf.mxu1 }
  0xca   : > { %v667_v6 = vadd.f32 %v666_v54, %v566_v46 }
  0xcb   : > { %v944_v32 = vadd.f32 %v898_v2, %v852_v27 }
  0xcc   : > { %1840 = vmatmul.msk.f32.gmra.mxu1 %vm506_vm2, %v2307_v36  ;;  %v997_v28 = vpop.f32.mrf.mxu0 }
  0xcd   : > { %v2518_v25 = vadd.f32 %v994_v18, %v944_v32  ;;  %1858 = vmatmul.msk.f32.gmra.mxu2 %vm506_vm2, %v2167_v34  ;;  %1876 = vmatmul.msk.f32.gmra.mxu3 %vm506_vm2, %v2223_v57 }
  0xcf   : > { %1894 = vmatmul.msk.f32.gmra.mxu0 %vm506_vm2, %v2332_v17 }
  0xd0   : > { %v809_v33 = vpop.f32.mrf.mxu2  ;;  %v901_v22 = vpop.f32.mrf.mxu3 }
  0xd1   : > { %v853_v21 = vadd.f32 %v809_v33, %v667_v6  ;;  %v669_v31 = vpop.f32.mrf.mxu1 }
  0xd2   : > { %v670_v34 = vadd.f32 %v669_v31, %v569_v63 }
  0xd3   : > { %v945_v50 = vadd.f32 %v901_v22, %v853_v21 }
  0xd4   : > { %1841 = vmatmul.msk.f32.gmra.mxu1 %vm506_vm2, %v2319_v44  ;;  %v1000_v36 = vpop.f32.mrf.mxu0 }
  0xd5   : > { %v2528_v55 = vadd.f32 %v997_v28, %v945_v50  ;;  %1859 = vmatmul.msk.f32.gmra.mxu2 %vm506_vm2, %v2170_v35  ;;  %1877 = vmatmul.msk.f32.gmra.mxu3 %vm506_vm2, %v2253_v8 }
  0xd7   : > { %1895 = vmatmul.msk.f32.gmra.mxu0 %vm506_vm2, %v2344_v48 }
  0xd8   : > { %v812_v57 = vpop.f32.mrf.mxu2  ;;  %v904_v46 = vpop.f32.mrf.mxu3 }
  0xd9   : > { %v854_v18 = vadd.f32 %v812_v57, %v670_v34  ;;  %v672_v5 = vpop.f32.mrf.mxu1 }
  0xda   : > { %v673_v35 = vadd.f32 %v672_v5, %v2407_v0 }
  0xdb   : > { %v946_v19 = vadd.f32 %v904_v46, %v854_v18 }
  0xdc   : > { %1842 = vmatmul.msk.f32.gmra.mxu1 %vm506_vm2, %v2332_v17  ;;  %v1003_v44 = vpop.f32.mrf.mxu0 }
  0xdd   : > { %v2538_v2 = vadd.f32 %v1000_v36, %v946_v19  ;;  %1860 = vmatmul.msk.f32.gmra.mxu2 %vm506_vm2, %v2105_v7  ;;  %1878 = vmatmul.msk.f32.gmra.mxu3 %vm506_vm2, %v2141_v23 }
  0xdf   : > { %1896 = vmatmul.msk.f32.gmra.mxu0 %vm506_vm2, %v2357_v51 }
  0xe0   : > { %v815_v8 = vpop.f32.mrf.mxu2  ;;  %v907_v63 = vpop.f32.mrf.mxu3 }
  0xe1   : > { %v855_v27 = vadd.f32 %v815_v8, %v673_v35  ;;  %v675_v54 = vpop.f32.mrf.mxu1 }
  0xe2   : > { %v676_v7 = vadd.f32 %v675_v54, %v2426_v15 }
  0xe3   : > { %v947_v32 = vadd.f32 %v907_v63, %v855_v27 }
  0xe4   : > { %1843 = vmatmul.msk.f32.gmra.mxu1 %vm506_vm2, %v2344_v48  ;;  %v1006_v17 = vpop.f32.mrf.mxu0 }
  0xe5   : > { %v2549_v28 = vadd.f32 %v1003_v44, %v947_v32  ;;  %1861 = vmatmul.msk.f32.gmra.mxu2 %vm506_vm2, %v2110_v10  ;;  %1879 = vmatmul.msk.f32.gmra.mxu3 %vm506_vm2, %v2176_v37 }
  0xe7   : > { %1897 = vmatmul.msk.f32.gmra.mxu0 %vm506_vm2, %v2369_v53 }
  0xe8   : > { %v818_v23 = vpop.f32.mrf.mxu2  ;;  %v910_v0 = vpop.f32.mrf.mxu3 }
  0xe9   : > { %v856_v6 = vadd.f32 %v818_v23, %v676_v7  ;;  %v678_v33 = vpop.f32.mrf.mxu1 }
  0xea   : > { %v679_v10 = vadd.f32 %v678_v33, %v2454_v41 }
  0xeb   : > { %v948_v22 = vadd.f32 %v910_v0, %v856_v6  ;;  %v1056_v0 = vrot.slane %v2440_v26, 2 }
  0xec   : > { %1844 = vmatmul.msk.f32.gmra.mxu1 %vm506_vm2, %v2357_v51  ;;  %v1009_v48 = vpop.f32.mrf.mxu0 }
  0xed   : > { %v2560_v21 = vadd.f32 %v1006_v17, %v948_v22  ;;  %1862 = vmatmul.msk.f32.gmra.mxu2 %vm506_vm2, %v2182_v39  ;;  %1880 = vmatmul.msk.f32.gmra.mxu3 %vm506_vm2, %v2226_v58 }
  0xef   : > { %1898 = vmatmul.msk.f32.gmra.mxu0 %vm506_vm2, %v2382_v20 }
  0xf0   : > { %v821_v37 = vpop.f32.mrf.mxu2  ;;  %v913_v15 = vpop.f32.mrf.mxu3 }
  0xf1   : > { %v857_v31 = vadd.f32 %v821_v37, %v679_v10  ;;  %v681_v50 = vpop.f32.mrf.mxu1 }
  0xf2   : > { %v682_v39 = vadd.f32 %v681_v50, %v2478_v56 }
  0xf3   : > { %v949_v36 = vadd.f32 %v913_v15, %v857_v31 }
  0xf4   : > { %1845 = vmatmul.msk.f32.gmra.mxu1 %vm506_vm2, %v2369_v53  ;;  %v1012_v51 = vpop.f32.mrf.mxu0 }
  0xf5   : > { %v2571_v34 = vadd.f32 %v1009_v48, %v949_v36  ;;  %1863 = vmatmul.msk.f32.gmra.mxu2 %vm506_vm2, %v2185_v40  ;;  %1881 = vmatmul.msk.f32.gmra.mxu3 %vm506_vm2, %v2256_v9 }
  0xf7   : > { %1899 = vmatmul.msk.f32.gmra.mxu0 %vm506_vm2, %v2395_v60 }
  0xf8   : > { %v824_v58 = vpop.f32.mrf.mxu2  ;;  %v916_v41 = vpop.f32.mrf.mxu3 }
  0xf9   : > { %v858_v57 = vadd.f32 %v824_v58, %v682_v39  ;;  %v684_v46 = vpop.f32.mrf.mxu1  ;;  %v2796_v58 = vld [vmem:[#allocation4_spill] sm:$0xff] }
  0xfa   : > { %v685_v40 = vadd.f32 %v684_v46, %v2422_v4 }
  0xfb   : > { %v950_v18 = vadd.f32 %v916_v41, %v858_v57  ;;  %v2797_v57 = vld [vmem:[#allocation2_spill] sm:$0xff] }
  0xfc   : > { %1846 = vmatmul.msk.f32.gmra.mxu1 %vm506_vm2, %v2382_v20  ;;  %v1015_v53 = vpop.f32.mrf.mxu0 }
  0xfd   : > { %v2582_v5 = vadd.f32 %v1012_v51, %v950_v18  ;;  %1864 = vmatmul.msk.f32.gmra.mxu2 %vm506_vm2, %v2114_v12  ;;  %1882 = vmatmul.msk.f32.gmra.mxu3 %vm506_vm2, %v2144_v24  ;;  %v436_v51 = vld [vmem:[%s388_s30 + $0x8] sm:$0xff] }
  0xfe   : > { %v1244_v41 = vrot.slane %v436_v51, 1 }
  0xff   : > { %1900 = vmatmul.msk.f32.gmra.mxu0 %vm506_vm2, %v2410_v1 }
 0x100   : > { %v827_v9 = vpop.f32.mrf.mxu2  ;;  %v919_v56 = vpop.f32.mrf.mxu3 }
 0x101   : > { %v859_v19 = vadd.f32 %v827_v9, %v685_v40  ;;  %v687_v44 = vpop.f32.mrf.mxu1  ;;  %v1339_v40 = vrot.slane %v436_v51, 2 }
 0x102   : > { %v688_v12 = vadd.f32 %v687_v44, %v2448_v30 }
 0x103   : > { %v951_v20 = vadd.f32 %v919_v56, %v859_v19 }
 0x104   : > { %1847 = vmatmul.msk.f32.gmra.mxu1 %vm506_vm2, %v2395_v60  ;;  %v1018_v35 = vpop.f32.mrf.mxu0 }
 0x105   : > { %v2593_v8 = vadd.f32 %v1015_v53, %v951_v20  ;;  %1865 = vmatmul.msk.f32.gmra.mxu2 %vm506_vm2, %v2117_v13  ;;  %1883 = vmatmul.msk.f32.gmra.mxu3 %vm506_vm2, %v2179_v38  ;;  %v437_v20 = vld [vmem:[%s388_s30 + $0x10] sm:$0x3] }
 0x107   : > { %1901 = vmatmul.msk.f32.gmra.mxu0 %vm506_vm2, %v2429_v16 }
 0x108   : > { %v830_v24 = vpop.f32.mrf.mxu2  ;;  %v922_v4 = vpop.f32.mrf.mxu3 }
 0x109   : > { %v860_v63 = vadd.f32 %v830_v24, %v688_v12  ;;  %v690_v27 = vpop.f32.mrf.mxu1  ;;  %v1246_v24 = vrot.slane %v437_v20, 1 }
 0x10a   : > { %v691_v13 = vadd.f32 %v690_v27, %v2473_v52  ;;  %v1055_v52 = vrot.slane %v2444_v29, 2 }
 0x10b   : > { %v952_v54 = vadd.f32 %v922_v4, %v860_v63  ;;  %v2798_v4 = vld [vmem:[#allocation3_spill] sm:$0xff] }
 0x10c   : > { %1848 = vmatmul.msk.f32.gmra.mxu1 %vm506_vm2, %v2410_v1  ;;  %v1021_v60 = vpop.f32.mrf.mxu0 }
 0x10d   : > { %v2605_v32 = vadd.f32 %v1018_v35, %v952_v54  ;;  %1866 = vmatmul.msk.f32.gmra.mxu2 %vm506_vm2, %v2192_v42  ;;  %1884 = vmatmul.msk.f32.gmra.mxu3 %vm506_vm2, %v2229_v59 }
 0x10f   : > { %1902 = vmatmul.msk.f32.gmra.mxu0 %vm506_vm2, %v2457_v45 }
 0x110   : > { %v833_v38 = vpop.f32.mrf.mxu2  ;;  %v925_v30 = vpop.f32.mrf.mxu3 }
 0x111   : > { %v861_v17 = vadd.f32 %v833_v38, %v691_v13  ;;  %v693_v7 = vpop.f32.mrf.mxu1 }
 0x112   : > { %v694_v59 = vadd.f32 %v693_v7, %v2494_v3 }
 0x113   : > { %v953_v1 = vadd.f32 %v925_v30, %v861_v17  ;;  %v1247_v30 = vsel %vm463_vm1, %v1244_v41, %v1246_v24 }
 0x114   : > { %1849 = vmatmul.msk.f32.gmra.mxu1 %vm506_vm2, %v2429_v16  ;;  %v1024_v42 = vpop.f32.mrf.mxu0 }
 0x115   : > { %v2616_v23 = vadd.f32 %v1021_v60, %v953_v1  ;;  %1867 = vmatmul.msk.f32.gmra.mxu2 %vm506_vm2, %v2195_v43  ;;  %1885 = vmatmul.msk.f32.gmra.mxu3 %vm506_vm2, %v2259_v11  ;;  %v1057_v11 = vsel %vm708_vm3, %v1055_v52, %v1056_v0  ;;  %v1341_v60 = vrot.slane %v437_v20, 2 }
 0x117   : > { %1903 = vmatmul.msk.f32.gmra.mxu0 %vm506_vm2, %v2481_v61  ;;  %v1342_v1 = vsel %vm708_vm3, %v1339_v40, %v1341_v60 }
 0x118   : > { %v836_v16 = vpop.f32.mrf.mxu2  ;;  %v928_v6 = vpop.f32.mrf.mxu3 }
 0x119   : > { %v862_v33 = vadd.f32 %v836_v16, %v694_v59  ;;  %v696_v22 = vpop.f32.mrf.mxu1  ;;  %v2799_v59 = vld [vmem:[#allocation5_spill] sm:$0xff] }
 0x11a   : > { %v697_v10 = vadd.f32 %v696_v22, %v2424_v14 }
 0x11b   : > { %v954_v48 = vadd.f32 %v928_v6, %v862_v33 }
 0x11c   : > { %1850 = vmatmul.msk.f32.gmra.mxu1 %vm506_vm2, %v2457_v45  ;;  %v1027_v43 = vpop.f32.mrf.mxu0  ;;  %v1058_v45 = vrot.slane %v2468_v49, 2 }
 0x11d   : > { %v2631_v3 = vadd.f32 %v1024_v42, %v954_v48  ;;  %1868 = vmatmul.msk.f32.gmra.mxu2 %vm506_vm2, %v2444_v29  ;;  %1886 = vmatmul.msk.f32.gmra.mxu3 %vm506_vm2, %v2462_v47  ;;  %v435_v29 = vld [vmem:[%s388_s30] sm:$0xff] }
 0x11e   : > { %v1059_v14 = vsel %vm708_vm3, %v1056_v0, %v1058_v45  ;;  %v1243_v49 = vrot.slane %v435_v29, 1 }
 0x11f   : > { %1904 = vmatmul.msk.f32.gmra.mxu0 %vm506_vm2, %v1057_v11 }
 0x120   : > { %v839_v37 = vpop.f32.mrf.mxu2  ;;  %v931_v15 = vpop.f32.mrf.mxu3  ;;  %v1245_v19 = vsel %vm463_vm1, %v1243_v49, %v1244_v41 }
 0x121   : > { %v863_v31 = vadd.f32 %v839_v37, %v697_v10  ;;  %v699_v50 = vpop.f32.mrf.mxu1 }
 0x122   : > { %v700_v46 = vadd.f32 %v699_v50, %v2797_v57 }
 0x123   : > { %v955_v36 = vadd.f32 %v931_v15, %v863_v31 }
 0x124   : > { %1851 = vmatmul.msk.f32.gmra.mxu1 %vm506_vm2, %v2481_v61  ;;  %v1030_v47 = vpop.f32.mrf.mxu0  ;;  %v1338_v61 = vrot.slane %v435_v29, 2 }
 0x125   : > { %v2646_v39 = vadd.f32 %v1027_v43, %v955_v36  ;;  %1869 = vmatmul.msk.f32.gmra.mxu2 %vm506_vm2, %v2440_v26  ;;  %1887 = vmatmul.msk.f32.gmra.mxu3 %vm506_vm2, %v2796_v58 }
 0x126   : > { %v1340_v35 = vsel %vm708_vm3, %v1338_v61, %v1339_v40 }
 0x127   : > { %1905 = vmatmul.msk.f32.gmra.mxu0 %vm506_vm2, %v1059_v14 }
 0x128   : > { %v842_v18 = vpop.f32.mrf.mxu2  ;;  %v934_v53 = vpop.f32.mrf.mxu3 }
 0x129   : > { %v864_v9 = vadd.f32 %v842_v18, %v700_v46  ;;  %v702_v56 = vpop.f32.mrf.mxu1 }
 0x12a   : > { %v703_v63 = vadd.f32 %v702_v56, %v2798_v4 }
 0x12b   : > { %v956_v44 = vadd.f32 %v934_v53, %v864_v9 }
 0x12c   : > { %1852 = vmatmul.msk.f32.gmra.mxu1 %vm506_vm2, %v1057_v11  ;;  %v1033_v26 = vpop.f32.mrf.mxu0 }
 0x12d   : > { %v2657_v12 = vadd.f32 %v1030_v47, %v956_v44  ;;  %1870 = vmatmul.msk.f32.gmra.mxu2 %vm506_vm2, %v435_v29  ;;  %1888 = vmatmul.msk.f32.gmra.mxu3 %vm506_vm2, %v1245_v19 }
 0x12f   : > { %1906 = vmatmul.msk.f32.gmra.mxu0 %vm506_vm2, %v1340_v35 }
 0x130   : > { %v845_v27 = vpop.f32.mrf.mxu2  ;;  %v937_v54 = vpop.f32.mrf.mxu3 }
 0x131   : > { %v865_v13 = vadd.f32 %v845_v27, %v703_v63  ;;  %v705_v38 = vpop.f32.mrf.mxu1 }
 0x132   : > { %v706_v52 = vadd.f32 %v705_v38, %v2799_v59 }
 0x133   : > { %v957_v17 = vadd.f32 %v937_v54, %v865_v13 }
 0x134   : > { %1853 = vmatmul.msk.f32.gmra.mxu1 %vm506_vm2, %v1059_v14  ;;  %v1036_v7 = vpop.f32.mrf.mxu0 }
 0x135   : > { %v2667_v42 = vadd.f32 %v1033_v26, %v957_v17  ;;  %1871 = vmatmul.msk.f32.gmra.mxu2 %vm506_vm2, %v436_v51  ;;  %1889 = vmatmul.msk.f32.gmra.mxu3 %vm506_vm2, %v1247_v30 }
 0x137   : > { %1907 = vmatmul.msk.f32.gmra.mxu0 %vm506_vm2, %v1342_v1 }
 0x138   : > { %v848_v0 = vpop.f32.mrf.mxu2  ;;  %v940_v16 = vpop.f32.mrf.mxu3 }
 0x139   : > { %v866_v6 = vadd.f32 %v848_v0, %v706_v52  ;;  %v1086_v33 = vpop.f32.mrf.mxu1 }
 0x13a   : > { %v1134_v11 = vadd.f32 %v1086_v33, %v2508_v62 }
 0x13b   : > { %v958_v22 = vadd.f32 %v940_v16, %v866_v6 }
 0x13c   : > { %v1369_v48 = vpop.f32.mrf.mxu0 }
 0x13d   : > { %v2678_v43 = vadd.f32 %v1036_v7, %v958_v22 }
 0x140   : > { %v1178_v10 = vpop.f32.mrf.mxu2  ;;  %v1274_v37 = vpop.f32.mrf.mxu3 }
 0x141   : > { %v1226_v15 = vadd.f32 %v1178_v10, %v1134_v11  ;;  %v1089_v45 = vpop.f32.mrf.mxu1 }
 0x142   : > { %v1135_v29 = vadd.f32 %v1089_v45, %v2518_v25 }
 0x143   : > { %v1322_v31 = vadd.f32 %v1274_v37, %v1226_v15 }
 0x144   : > { %v1372_v50 = vpop.f32.mrf.mxu0 }
 0x145   : > { %v1417_v36 = vadd.f32 %v1369_v48, %v1322_v31 }
 0x147   : > { %1527 = vst.msk [vmem:[%s2684_s13] sm:$0xff] %vm1433_vm4, %v1417_v36  ;;  %v1473_v41 = vmul.f32 %v1417_v36, %v1417_v36  ;;  %v1434_v46 = vsel %vm1433_vm4, %v1417_v36, 0.0 }
 0x148   : > { %v1181_v62 = vpop.f32.mrf.mxu2  ;;  %v1277_v51 = vpop.f32.mrf.mxu3 }
 0x149   : > { %v1227_v47 = vadd.f32 %v1181_v62, %v1135_v29  ;;  %v1092_v14 = vpop.f32.mrf.mxu1  ;;  %v1489_v56 = vsel %vm1433_vm4, %v1473_v41, 0.0 }
 0x14a   : > { %v1136_v18 = vadd.f32 %v1092_v14, %v2528_v55 }
 0x14b   : > { %v1323_v58 = vadd.f32 %v1277_v51, %v1227_v47 }
 0x14c   : > { %v1375_v49 = vpop.f32.mrf.mxu0 }
 0x14d   : > { %v1418_v57 = vadd.f32 %v1372_v50, %v1323_v58 }
 0x14f   : > { %v1435_v53 = vsel %vm1433_vm4, %v1418_v57, 0.0  ;;  %v1474_v61 = vmul.f32 %v1418_v57, %v1418_v57  ;;  %1528 = vst.msk [vmem:[%s2684_s13 + $0x8] sm:$0xff] %vm1433_vm4, %v1418_v57 }
 0x150   : > { %v1436_v25 = vadd.f32 %v1435_v53, %v1434_v46  ;;  %v1184_v40 = vpop.f32.mrf.mxu2  ;;  %v1280_v9 = vpop.f32.mrf.mxu3 }
 0x151   : > { %v1490_v19 = vsel %vm1433_vm4, %v1474_v61, 0.0  ;;  %v1228_v44 = vadd.f32 %v1184_v40, %v1136_v18  ;;  %v1095_v20 = vpop.f32.mrf.mxu1 }
 0x152   : > { %v1491_v26 = vadd.f32 %v1490_v19, %v1489_v56  ;;  %v1137_v55 = vadd.f32 %v1095_v20, %v2538_v2 }
 0x153   : > { %v1324_v35 = vadd.f32 %v1280_v9, %v1228_v44 }
 0x154   : > { %v1378_v24 = vpop.f32.mrf.mxu0 }
 0x155   : > { %v1419_v4 = vadd.f32 %v1375_v49, %v1324_v35 }
 0x157   : > { %v1437_v63 = vsel %vm1433_vm4, %v1419_v4, 0.0  ;;  %v1475_v27 = vmul.f32 %v1419_v4, %v1419_v4  ;;  %1529 = vst.msk [vmem:[%s2684_s13 + $0x10] sm:$0xff] %vm1433_vm4, %v1419_v4 }
 0x158   : > { %v1438_v54 = vadd.f32 %v1437_v63, %v1436_v25  ;;  %v1187_v60 = vpop.f32.mrf.mxu2  ;;  %v1283_v13 = vpop.f32.mrf.mxu3 }
 0x159   : > { %v1492_v38 = vsel %vm1433_vm4, %v1475_v27, 0.0  ;;  %v1229_v30 = vadd.f32 %v1187_v60, %v1137_v55  ;;  %v1098_v17 = vpop.f32.mrf.mxu1 }
 0x15a   : > { %v1493_v7 = vadd.f32 %v1492_v38, %v1491_v26  ;;  %v1138_v0 = vadd.f32 %v1098_v17, %v2549_v28 }
 0x15b   : > { %v1325_v1 = vadd.f32 %v1283_v13, %v1229_v30 }
 0x15c   : > { %v1381_v59 = vpop.f32.mrf.mxu0 }
 0x15d   : > { %v1420_v52 = vadd.f32 %v1378_v24, %v1325_v1 }
 0x15f   : > { %v1439_v2 = vsel %vm1433_vm4, %v1420_v52, 0.0  ;;  %v1476_v16 = vmul.f32 %v1420_v52, %v1420_v52  ;;  %1530 = vst.msk [vmem:[%s2684_s13 + $0x18] sm:$0xff] %vm1433_vm4, %v1420_v52 }
 0x160   : > { %v1440_v6 = vadd.f32 %v1439_v2, %v1438_v54  ;;  %v1190_v33 = vpop.f32.mrf.mxu2  ;;  %v1286_v22 = vpop.f32.mrf.mxu3 }
 0x161   : > { %v1494_v48 = vsel %vm1433_vm4, %v1476_v16, 0.0  ;;  %v1230_v11 = vadd.f32 %v1190_v33, %v1138_v0  ;;  %v1101_v10 = vpop.f32.mrf.mxu1 }
 0x162   : > { %v1495_v37 = vadd.f32 %v1494_v48, %v1493_v7  ;;  %v1139_v50 = vadd.f32 %v1101_v10, %v2560_v21 }
 0x163   : > { %v1326_v15 = vadd.f32 %v1286_v22, %v1230_v11 }
 0x164   : > { %v1384_v45 = vpop.f32.mrf.mxu0 }
 0x165   : > { %v1421_v31 = vadd.f32 %v1381_v59, %v1326_v15 }
 0x167   : > { %v1441_v28 = vsel %vm1433_vm4, %v1421_v31, 0.0  ;;  %v1477_v36 = vmul.f32 %v1421_v31, %v1421_v31  ;;  %1531 = vst.msk [vmem:[%s2684_s13 + $0x20] sm:$0xff] %vm1433_vm4, %v1421_v31 }
 0x168   : > { %v1442_v29 = vadd.f32 %v1441_v28, %v1440_v6  ;;  %v1193_v62 = vpop.f32.mrf.mxu2  ;;  %v1289_v51 = vpop.f32.mrf.mxu3 }
 0x169   : > { %v1496_v47 = vsel %vm1433_vm4, %v1477_v36, 0.0  ;;  %v1231_v14 = vadd.f32 %v1193_v62, %v1139_v50  ;;  %v1104_v58 = vpop.f32.mrf.mxu1 }
 0x16a   : > { %v1497_v49 = vadd.f32 %v1496_v47, %v1495_v37  ;;  %v1140_v18 = vadd.f32 %v1104_v58, %v2571_v34 }
 0x16b   : > { %v1327_v41 = vadd.f32 %v1289_v51, %v1231_v14 }
 0x16c   : > { %v1387_v57 = vpop.f32.mrf.mxu0 }
 0x16d   : > { %v1422_v46 = vadd.f32 %v1384_v45, %v1327_v41 }
 0x16f   : > { %v1443_v21 = vsel %vm1433_vm4, %v1422_v46, 0.0  ;;  %v1478_v53 = vmul.f32 %v1422_v46, %v1422_v46  ;;  %1532 = vst.msk [vmem:[%s2684_s13 + $0x28] sm:$0xff] %vm1433_vm4, %v1422_v46 }
 0x170   : > { %v1444_v61 = vadd.f32 %v1443_v21, %v1442_v29  ;;  %v1196_v25 = vpop.f32.mrf.mxu2  ;;  %v1292_v40 = vpop.f32.mrf.mxu3 }
 0x171   : > { %v1498_v9 = vsel %vm1433_vm4, %v1478_v53, 0.0  ;;  %v1232_v56 = vadd.f32 %v1196_v25, %v1140_v18  ;;  %v1107_v19 = vpop.f32.mrf.mxu1 }
 0x172   : > { %v1499_v44 = vadd.f32 %v1498_v9, %v1497_v49  ;;  %v1141_v24 = vadd.f32 %v1107_v19, %v2582_v5 }
 0x173   : > { %v1328_v20 = vadd.f32 %v1292_v40, %v1232_v56 }
 0x174   : > { %v1390_v26 = vpop.f32.mrf.mxu0 }
 0x175   : > { %v1423_v35 = vadd.f32 %v1387_v57, %v1328_v20 }
 0x177   : > { %v1445_v34 = vsel %vm1433_vm4, %v1423_v35, 0.0  ;;  %v1479_v4 = vmul.f32 %v1423_v35, %v1423_v35  ;;  %1533 = vst.msk [vmem:[%s2684_s13 + $0x30] sm:$0xff] %vm1433_vm4, %v1423_v35 }
 0x178   : > { %v1446_v55 = vadd.f32 %v1445_v34, %v1444_v61  ;;  %v1199_v63 = vpop.f32.mrf.mxu2  ;;  %v1295_v27 = vpop.f32.mrf.mxu3 }
 0x179   : > { %v1500_v54 = vsel %vm1433_vm4, %v1479_v4, 0.0  ;;  %v1233_v60 = vadd.f32 %v1199_v63, %v1141_v24  ;;  %v1110_v13 = vpop.f32.mrf.mxu1 }
 0x17a   : > { %v1501_v38 = vadd.f32 %v1500_v54, %v1499_v44  ;;  %v1142_v1 = vadd.f32 %v1110_v13, %v2593_v8 }
 0x17b   : > { %v1329_v30 = vadd.f32 %v1295_v27, %v1233_v60 }
 0x17c   : > { %v1393_v17 = vpop.f32.mrf.mxu0 }
 0x17d   : > { %v1424_v7 = vadd.f32 %v1390_v26, %v1329_v30 }
 0x17f   : > { %v1447_v5 = vsel %vm1433_vm4, %v1424_v7, 0.0  ;;  %v1480_v59 = vmul.f32 %v1424_v7, %v1424_v7  ;;  %1534 = vst.msk [vmem:[%s2684_s13 + $0x38] sm:$0xff] %vm1433_vm4, %v1424_v7 }
 0x180   : > { %v1448_v52 = vadd.f32 %v1447_v5, %v1446_v55  ;;  %v1202_v0 = vpop.f32.mrf.mxu2  ;;  %v1298_v2 = vpop.f32.mrf.mxu3 }
 0x181   : > { %v1502_v16 = vsel %vm1433_vm4, %v1480_v59, 0.0  ;;  %v1234_v6 = vadd.f32 %v1202_v0, %v1142_v1  ;;  %v1113_v33 = vpop.f32.mrf.mxu1 }
 0x182   : > { %v1503_v22 = vadd.f32 %v1502_v16, %v1501_v38  ;;  %v1143_v37 = vadd.f32 %v1113_v33, %v2605_v32 }
 0x183   : > { %v1330_v48 = vadd.f32 %v1298_v2, %v1234_v6 }
 0x184   : > { %v1396_v11 = vpop.f32.mrf.mxu0 }
 0x185   : > { %v1425_v10 = vadd.f32 %v1393_v17, %v1330_v48 }
 0x187   : > { %v1449_v8 = vsel %vm1433_vm4, %v1425_v10, 0.0  ;;  %v1481_v15 = vmul.f32 %v1425_v10, %v1425_v10  ;;  %1535 = vst.msk [vmem:[%s2684_s13 + $0x40] sm:$0xff] %vm1433_vm4, %v1425_v10 }
 0x188   : > { %v1450_v45 = vadd.f32 %v1449_v8, %v1448_v52  ;;  %v1205_v31 = vpop.f32.mrf.mxu2  ;;  %v1301_v50 = vpop.f32.mrf.mxu3 }
 0x189   : > { %v1504_v28 = vsel %vm1433_vm4, %v1481_v15, 0.0  ;;  %v1235_v36 = vadd.f32 %v1205_v31, %v1143_v37  ;;  %v1116_v29 = vpop.f32.mrf.mxu1 }
 0x18a   : > { %v1505_v62 = vadd.f32 %v1504_v28, %v1503_v22  ;;  %v1144_v58 = vadd.f32 %v1116_v29, %v2616_v23 }
 0x18b   : > { %v1331_v51 = vadd.f32 %v1301_v50, %v1235_v36 }
 0x18c   : > { %v1399_v47 = vpop.f32.mrf.mxu0 }
 0x18d   : > { %v1426_v14 = vadd.f32 %v1396_v11, %v1331_v51 }
 0x18f   : > { %v1451_v32 = vsel %vm1433_vm4, %v1426_v14, 0.0  ;;  %v1482_v49 = vmul.f32 %v1426_v14, %v1426_v14  ;;  %1536 = vst.msk [vmem:[%s2684_s13 + $0x48] sm:$0xff] %vm1433_vm4, %v1426_v14 }
 0x190   : > { %v1452_v41 = vadd.f32 %v1451_v32, %v1450_v45  ;;  %v1208_v57 = vpop.f32.mrf.mxu2  ;;  %v1304_v46 = vpop.f32.mrf.mxu3 }
 0x191   : > { %v1506_v18 = vsel %vm1433_vm4, %v1482_v49, 0.0  ;;  %v1236_v21 = vadd.f32 %v1208_v57, %v1144_v58  ;;  %v1119_v53 = vpop.f32.mrf.mxu1 }
 0x192   : > { %v1507_v61 = vadd.f32 %v1506_v18, %v1505_v62  ;;  %v1145_v56 = vadd.f32 %v1119_v53, %v2631_v3 }
 0x193   : > { %v1332_v25 = vadd.f32 %v1304_v46, %v1236_v21 }
 0x194   : > { %v1402_v40 = vpop.f32.mrf.mxu0 }
 0x195   : > { %v1427_v9 = vadd.f32 %v1399_v47, %v1332_v25 }
 0x197   : > { %v1453_v23 = vsel %vm1433_vm4, %v1427_v9, 0.0  ;;  %v1483_v19 = vmul.f32 %v1427_v9, %v1427_v9  ;;  %1537 = vst.msk [vmem:[%s2684_s13 + $0x50] sm:$0xff] %vm1433_vm4, %v1427_v9 }
 0x198   : > { %v1454_v44 = vadd.f32 %v1453_v23, %v1452_v41  ;;  %v1211_v20 = vpop.f32.mrf.mxu2  ;;  %v1307_v26 = vpop.f32.mrf.mxu3 }
 0x199   : > { %v1508_v35 = vsel %vm1433_vm4, %v1483_v19, 0.0  ;;  %v1237_v24 = vadd.f32 %v1211_v20, %v1145_v56  ;;  %v1122_v34 = vpop.f32.mrf.mxu1 }
 0x19a   : > { %v1509_v4 = vadd.f32 %v1508_v35, %v1507_v61  ;;  %v1146_v54 = vadd.f32 %v1122_v34, %v2646_v39 }
 0x19b   : > { %v1333_v55 = vadd.f32 %v1307_v26, %v1237_v24 }
 0x19c   : > { %v1405_v63 = vpop.f32.mrf.mxu0 }
 0x19d   : > { %v1428_v27 = vadd.f32 %v1402_v40, %v1333_v55 }
 0x19f   : > { %v1455_v3 = vsel %vm1433_vm4, %v1428_v27, 0.0  ;;  %v1484_v60 = vmul.f32 %v1428_v27, %v1428_v27  ;;  %1538 = vst.msk [vmem:[%s2684_s13 + $0x58] sm:$0xff] %vm1433_vm4, %v1428_v27 }
 0x1a0   : > { %v1456_v13 = vadd.f32 %v1455_v3, %v1454_v44  ;;  %v1214_v38 = vpop.f32.mrf.mxu2  ;;  %v1310_v30 = vpop.f32.mrf.mxu3 }
 0x1a1   : > { %v1510_v17 = vsel %vm1433_vm4, %v1484_v60, 0.0  ;;  %v1238_v7 = vadd.f32 %v1214_v38, %v1146_v54  ;;  %v1125_v1 = vpop.f32.mrf.mxu1 }
 0x1a2   : > { %v1511_v5 = vadd.f32 %v1510_v17, %v1509_v4  ;;  %v1147_v2 = vadd.f32 %v1125_v1, %v2657_v12 }
 0x1a3   : > { %v1334_v59 = vadd.f32 %v1310_v30, %v1238_v7 }
 0x1a4   : > { %v1408_v0 = vpop.f32.mrf.mxu0 }
 0x1a5   : > { %v1429_v52 = vadd.f32 %v1405_v63, %v1334_v59 }
 0x1a7   : > { %v1457_v39 = vsel %vm1433_vm4, %v1429_v52, 0.0  ;;  %v1485_v16 = vmul.f32 %v1429_v52, %v1429_v52  ;;  %1539 = vst.msk [vmem:[%s2684_s13 + $0x60] sm:$0xff] %vm1433_vm4, %v1429_v52 }
 0x1a8   : > { %v1458_v6 = vadd.f32 %v1457_v39, %v1456_v13  ;;  %v1217_v33 = vpop.f32.mrf.mxu2  ;;  %v1313_v22 = vpop.f32.mrf.mxu3 }
 0x1a9   : > { %v1512_v48 = vsel %vm1433_vm4, %v1485_v16, 0.0  ;;  %v1239_v11 = vadd.f32 %v1217_v33, %v1147_v2  ;;  %v1128_v37 = vpop.f32.mrf.mxu1 }
 0x1aa   : > { %v1513_v10 = vadd.f32 %v1512_v48, %v1511_v5  ;;  %v1148_v45 = vadd.f32 %v1128_v37, %v2667_v42 }
 0x1ab   : > { %v1335_v8 = vadd.f32 %v1313_v22, %v1239_v11 }
 0x1ac   : > { %v1411_v50 = vpop.f32.mrf.mxu0 }
 0x1ad   : > { %v1430_v15 = vadd.f32 %v1408_v0, %v1335_v8 }
 0x1af   : > { %v1459_v12 = vsel %vm1433_vm4, %v1430_v15, 0.0  ;;  %v1486_v31 = vmul.f32 %v1430_v15, %v1430_v15  ;;  %1540 = vst.msk [vmem:[%s2684_s13 + $0x68] sm:$0xff] %vm1433_vm4, %v1430_v15 }
 0x1b0   : > { %v1460_v28 = vadd.f32 %v1459_v12, %v1458_v6  ;;  %v1220_v36 = vpop.f32.mrf.mxu2  ;;  %v1316_v29 = vpop.f32.mrf.mxu3 }
 0x1b1   : > { %v1514_v62 = vsel %vm1433_vm4, %v1486_v31, 0.0  ;;  %v1240_v51 = vadd.f32 %v1220_v36, %v1148_v45  ;;  %v1131_v58 = vpop.f32.mrf.mxu1 }
 0x1b2   : > { %v1515_v47 = vadd.f32 %v1514_v62, %v1513_v10  ;;  %v1149_v42 = vadd.f32 %v1131_v58, %v2678_v43 }
 0x1b3   : > { %v1336_v14 = vadd.f32 %v1316_v29, %v1240_v51 }
 0x1b4   : > { %v1414_v25 = vpop.f32.mrf.mxu0 }
 0x1b5   : > { %v1431_v32 = vadd.f32 %v1411_v50, %v1336_v14 }
 0x1b7   : > { %v1461_v49 = vsel %vm1433_vm4, %v1431_v32, 0.0  ;;  %v1487_v41 = vmul.f32 %v1431_v32, %v1431_v32  ;;  %1541 = vst.msk [vmem:[%s2684_s13 + $0x70] sm:$0xff] %vm1433_vm4, %v1431_v32 }
 0x1b8   : > { %v1462_v57 = vadd.f32 %v1461_v49, %v1460_v28  ;;  %v1223_v46 = vpop.f32.mrf.mxu2  ;;  %v1319_v18 = vpop.f32.mrf.mxu3 }
 0x1b9   : > { %v1516_v21 = vsel %vm1433_vm4, %v1487_v41, 0.0  ;;  %v1241_v53 = vadd.f32 %v1223_v46, %v1149_v42 }
 0x1ba   : > { %v1517_v61 = vadd.f32 %v1516_v21, %v1515_v47 }
 0x1bb   : > { %v1337_v40 = vadd.f32 %v1319_v18, %v1241_v53 }
 0x1bd   : > { %v1432_v9 = vadd.f32 %v1414_v25, %v1337_v40 }
 0x1bf   : > { %v1463_v56 = vsel %vm1433_vm4, %v1432_v9, 0.0  ;;  %v1488_v43 = vmul.f32 %v1432_v9, %v1432_v9  ;;  %1542 = vst.msk [vmem:[%s2684_s13 + $0x78] sm:$0xff] %vm1433_vm4, %v1432_v9 }
 0x1c0   : > { %v1464_v23 = vadd.f32 %v1463_v56, %v1462_v57 }
 0x1c1   : > { %v1518_v19 = vsel %vm1433_vm4, %v1488_v43, 0.0 }
 0x1c2   : > { %v1465_v44 = vrot.slane %v1464_v23, 4  ;;  %v1519_v20 = vadd.f32 %v1518_v19, %v1517_v61 }
 0x1c4   : > { %v1466_v26 = vadd.f32 %v1465_v44, %v1464_v23  ;;  %v1520_v35 = vrot.slane %v1519_v20, 4 }
 0x1c6   : > { %v1467_v24 = vrot.slane %v1466_v26, 2  ;;  %v1521_v34 = vadd.f32 %v1520_v35, %v1519_v20 }
 0x1c8   : > { %v1468_v4 = vadd.f32 %v1467_v24, %v1466_v26  ;;  %v1522_v55 = vrot.slane %v1521_v34, 2 }
 0x1ca   : > { %v1469_v63 = vrot.slane %v1468_v4, 1  ;;  %v1523_v27 = vadd.f32 %v1522_v55, %v1521_v34 }
 0x1cc   : > { %v1470_v54 = vadd.f32 %v1469_v63, %v1468_v4  ;;  %v1524_v3 = vrot.slane %v1523_v27, 1 }
 0x1ce   : > { %1472 = vst.msk [vmem:[%s407_s27] sm:$0x1] %vm1471_vm5, %v1470_v54  ;;  %v1525_v60 = vadd.f32 %v1524_v3, %v1523_v27 }
 0x1d0   : > { %1526 = vst.msk [vmem:[%s407_s27 + $0x1] sm:$0x1] %vm1471_vm5, %v1525_v60 }
 0x1d1 PF: > { %s16_s22 = sadd.s32 1, %s1995_s22   ;;  %s2800_s18 = smov %s1987_s20 }
 0x1d2   : > { %p13_p10 = scmp.ge.s32.totalorder %s16_s22, 6   ;;  %s2801_s19 = smov %s1991_s21 }
 0x1d3   : > { %s2802_s20 = smov %s2805_s23  ;;  %s2803_s21 = smov %s2809_s24 }
 0x1d4   :  { %15 = sbr.rel (!%p13_p10) target bundleno = 3 (0x3), region = 92 }

</bundles_post_ra>
